<compile_context>
chip_gen: v7x
topology: tpu7x:2x2x1
jax: 0.10.0
libtpu: 0.0.40
codegen_flags: <defaults>
</compile_context>

<pallas_src>
import functools
import math

import jax
import jax.numpy as jnp
from jax.experimental import pallas as pl
from jax.experimental.pallas import tpu as pltpu


# --------------------------------------------------------------------------
# Per-chip VMEM budget / tile sizes
# --------------------------------------------------------------------------

def _detect_vmem_capacity():
    try:
        info = pltpu.get_tpu_info()
        for name in ("vmem_capacity_bytes", "vmem_bytes", "vmem_size_bytes"):
            v = getattr(info, name, None)
            if v:
                return int(v)
    except Exception:
        pass
    return 64 * 1024 * 1024   # conservative fallback (v7x per-TensorCore size)


_VMEM_CAP = _detect_vmem_capacity()
_BIG_VMEM = _VMEM_CAP >= 96 * 1024 * 1024          # v5e/v6e (128 MiB) vs v7x (64 MiB)
_VMEM_BUDGET = (100 if _BIG_VMEM else 44) * 1024 * 1024
_DEFAULT_TM = 512 if _BIG_VMEM else 256            # bigger M-tiles cut weight refetch
_DEFAULT_TN = 512


def _vmem_limit(bytes_needed):
    """Per-call scoped-VMEM limit: actual block footprint + slack, clamped to budget."""
    est = int(bytes_needed) + (8 << 20)
    return int(min(max(est, 24 << 20), _VMEM_BUDGET))


# --------------------------------------------------------------------------
# Fused LN? -> Linear -> bias -> act? -> +residual? kernel (bf16 in / f32 acc)
# --------------------------------------------------------------------------

def _make_linear_kernel(*, has_ln, act, has_res, eps):
    def kernel(*refs):
        idx = 0
        x_ref = refs[idx]; idx += 1
        if has_ln:
            g_ref = refs[idx]; idx += 1
            b_ref = refs[idx]; idx += 1
        w_ref = refs[idx]; idx += 1
        bias_ref = refs[idx]; idx += 1
        if has_res:
            res_ref = refs[idx]; idx += 1
        o_ref = refs[idx]; idx += 1

        if has_ln:
            xn_ref = refs[idx]                         # (bm, K) bf16 VMEM scratch
            # LN computed ONCE per M-tile: the inner grid axis (axis 1) revisits
            # the same x block, so only normalize when the N sweep starts.
            @pl.when(pl.program_id(1) == 0)
            def _():
                xf = x_ref[...].astype(jnp.float32)
                mean = jnp.mean(xf, axis=-1, keepdims=True)
                var = jnp.mean((xf - mean) * (xf - mean), axis=-1, keepdims=True)
                xn = (xf - mean) * jax.lax.rsqrt(var + eps)
                xn_ref[...] = (xn * g_ref[...] + b_ref[...]).astype(xn_ref.dtype)
            x = xn_ref[...]
        else:
            x = x_ref[...]

        y = jnp.dot(x, w_ref[...], preferred_element_type=jnp.float32)
        y = y + bias_ref[...]                          # f32 bias broadcast
        if act == "quick_gelu":                        # CLIP QuickGELU
            y = y * jax.nn.sigmoid(1.702 * y)
        if has_res:
            y = y + res_ref[...].astype(jnp.float32)
        o_ref[...] = y.astype(o_ref.dtype)
    return kernel


def fused_linear(x, w, bias, *, ln_gamma=None, ln_beta=None, act=None,
                 residual=None, out_dtype=jnp.bfloat16,
                 tm=None, tn=None, eps=1e-5):
    """y = act(LN?(x) @ w + bias) + residual?; x:(M,K) w:(K,N) bias:(N,)."""
    M, K = x.shape
    K2, N = w.shape
    assert K == K2
    tm = _DEFAULT_TM if tm is None else tm
    tn = _DEFAULT_TN if tn is None else tn
    # Full-dim blocks when small (legal per the (8,128) rule); 128-multiple
    # MXU-shaped tiles at large shapes.
    bm = M if M <= tm else tm
    bn = N if N <= tn else tn
    m_tiles = pl.cdiv(M, bm)
    n_tiles = pl.cdiv(N, bn)

    has_ln = ln_gamma is not None
    has_res = residual is not None

    # Grid ordering: keep the operand whose redundant HBM re-fetch would be
    # larger resident across the inner axis.  LN-fused matmuls stay
    # activation-stationary so the LayerNorm runs once per M-tile.
    x_stationary = has_ln or ((m_tiles - 1) * K * N <= (n_tiles - 1) * M * K)

    if x_stationary:
        grid = (m_tiles, n_tiles)
        x_map = lambda i, j: (i, 0)
        w_map = lambda i, j: (0, j)
        v_map = lambda i, j: (0, j)
        o_map = lambda i, j: (i, j)
        p_map = lambda i, j: (0, 0)
        semantics = ("parallel", "arbitrary") if has_ln else ("parallel", "parallel")
    else:
        grid = (n_tiles, m_tiles)
        x_map = lambda j, i: (i, 0)
        w_map = lambda j, i: (0, j)
        v_map = lambda j, i: (0, j)
        o_map = lambda j, i: (i, j)
        p_map = lambda j, i: (0, 0)
        semantics = ("parallel", "parallel")

    inputs = [x.astype(jnp.bfloat16)]                  # no-op: stream is bf16
    in_specs = [pl.BlockSpec((bm, K), x_map)]
    if has_ln:
        inputs += [ln_gamma.reshape(1, K).astype(jnp.float32),
                   ln_beta.reshape(1, K).astype(jnp.float32)]
        in_specs += [pl.BlockSpec((1, K), p_map), pl.BlockSpec((1, K), p_map)]
    inputs += [w.astype(jnp.bfloat16),                 # no-op: weights pre-cast at init
               bias.reshape(1, N).astype(jnp.float32)]
    in_specs += [pl.BlockSpec((K, bn), w_map), pl.BlockSpec((1, bn), v_map)]
    if has_res:
        inputs.append(residual.astype(jnp.bfloat16))
        in_specs.append(pl.BlockSpec((bm, bn), o_map))

    scratch_shapes = [pltpu.VMEM((bm, K), jnp.bfloat16)] if has_ln else []

    out_bytes = 4 if out_dtype == jnp.float32 else 2
    block_bytes = (bm * K * 2 + K * bn * 2 + bn * 4 + bm * bn * out_bytes
                   + (bm * bn * 2 if has_res else 0) + (2 * K * 4 if has_ln else 0))
    vmem_limit = _vmem_limit(2 * block_bytes + (bm * K * 2 if has_ln else 0))

    flops = 2 * M * K * N
    transcendentals = M * N if act == "quick_gelu" else 0
    bytes_accessed = 2 * (M * K + K * N + M * N) + 4 * N
    if has_res:
        bytes_accessed += 2 * M * N
    if has_ln:
        bytes_accessed += 8 * K

    kernel = _make_linear_kernel(has_ln=has_ln, act=act, has_res=has_res, eps=eps)
    return pl.pallas_call(
        kernel,
        out_shape=jax.ShapeDtypeStruct((M, N), out_dtype),
        grid=grid,
        in_specs=in_specs,
        out_specs=pl.BlockSpec((bm, bn), o_map),
        scratch_shapes=scratch_shapes,
        compiler_params=pltpu.CompilerParams(
            dimension_semantics=semantics,
            vmem_limit_bytes=vmem_limit),
        cost_estimate=pl.CostEstimate(flops=flops,
                                      transcendentals=transcendentals,
                                      bytes_accessed=bytes_accessed),
    )(*inputs)


# --------------------------------------------------------------------------
# Fused [CLS] concat + positional embedding + ln_pre (one HBM pass)
# --------------------------------------------------------------------------

def _embed_ln_kernel(x_ref, cls_ref, pos_ref, g_ref, b_ref, o_ref, *, eps):
    x = x_ref[0].astype(jnp.float32)                              # (num_patches, W)
    tok = jnp.concatenate([cls_ref[...].astype(jnp.float32), x], axis=0)   # (S, W)
    tok = tok + pos_ref[...].astype(jnp.float32)
    mean = jnp.mean(tok, axis=-1, keepdims=True)
    var = jnp.mean((tok - mean) * (tok - mean), axis=-1, keepdims=True)
    tokn = (tok - mean) * jax.lax.rsqrt(var + eps)
    o_ref[0] = (tokn * g_ref[...] + b_ref[...]).astype(o_ref.dtype)


def embed_and_ln_pre(x, class_emb, pos_emb, gamma, beta, *, eps=1e-5,
                     out_dtype=jnp.bfloat16):
    B, num_patches, width = x.shape
    S = num_patches + 1
    block_bytes = num_patches * width * 2 + (S + 3) * width * 4 + S * width * 2
    return pl.pallas_call(
        functools.partial(_embed_ln_kernel, eps=eps),
        out_shape=jax.ShapeDtypeStruct((B, S, width), out_dtype),
        grid=(B,),
        in_specs=[pl.BlockSpec((1, num_patches, width), lambda b: (b, 0, 0)),
                  pl.BlockSpec((1, width), lambda b: (0, 0)),
                  pl.BlockSpec((S, width), lambda b: (0, 0)),
                  pl.BlockSpec((1, width), lambda b: (0, 0)),
                  pl.BlockSpec((1, width), lambda b: (0, 0))],
        out_specs=pl.BlockSpec((1, S, width), lambda b: (b, 0, 0)),
        compiler_params=pltpu.CompilerParams(
            dimension_semantics=("parallel",),
            vmem_limit_bytes=_vmem_limit(2 * block_bytes)),
    )(x.astype(jnp.bfloat16),
      class_emb.reshape(1, width).astype(jnp.float32),
      pos_emb.astype(jnp.float32),
      gamma.reshape(1, width).astype(jnp.float32),
      beta.reshape(1, width).astype(jnp.float32))


# --------------------------------------------------------------------------
# Multi-head attention over the fused QKV buffer: head-batched matmuls,
# one softmax, one lane-dense full-width output store per grid step.
# --------------------------------------------------------------------------

def _attention_kernel(qkv_ref, o_ref, *, width, heads):
    dh = width // heads
    qkv = qkv_ref[0]                                              # (S, 3*width) bf16
    # Head split via static lane slices, stacked once to (heads, S, dh) so that
    # QK^T, softmax and PV each run ONCE as head-batched ops.
    q = jnp.stack([qkv[:, h * dh:(h + 1) * dh] for h in range(heads)], axis=0)
    k = jnp.stack([qkv[:, width + h * dh: width + (h + 1) * dh]
                   for h in range(heads)], axis=0)
    v = jnp.stack([qkv[:, 2 * width + h * dh: 2 * width + (h + 1) * dh]
                   for h in range(heads)], axis=0)
    # 1/sqrt(dh) softmax scale is pre-folded into the Q projection weights.
    s = jax.lax.dot_general(q, k, (((2,), (2,)), ((0,), (0,))),
                            preferred_element_type=jnp.float32)   # (H, S, S)
    m = jnp.max(s, axis=-1, keepdims=True)
    p = jnp.exp(s - m)
    inv = pl.reciprocal(jnp.sum(p, axis=-1, keepdims=True), approx=True)
    p = (p * inv).astype(jnp.bfloat16)
    o = jax.lax.dot_general(p, v, (((2,), (1,)), ((0,), (0,))),
                            preferred_element_type=jnp.float32)   # (H, S, dh)
    out = jnp.concatenate([o[h] for h in range(heads)], axis=-1)  # (S, width)
    o_ref[0] = out.astype(o_ref.dtype)                            # single full-width store


def fused_attention(qkv, *, batch, seq, width, heads, out_dtype=jnp.bfloat16):
    """softmax(q k^T / sqrt(Dh)) v; qkv:(batch*seq, 3*width) -> (batch, seq, width)."""
    dh = width // heads
    qkv3 = qkv.reshape(batch, seq, 3 * width).astype(jnp.bfloat16)
    block_bytes = seq * 4 * width * 2 + heads * seq * seq * 4
    return pl.pallas_call(
        functools.partial(_attention_kernel, width=width, heads=heads),
        out_shape=jax.ShapeDtypeStruct((batch, seq, width), out_dtype),
        grid=(batch,),
        in_specs=[pl.BlockSpec((1, seq, 3 * width), lambda b: (b, 0, 0))],
        out_specs=pl.BlockSpec((1, seq, width), lambda b: (b, 0, 0)),
        compiler_params=pltpu.CompilerParams(
            dimension_semantics=("parallel",),
            vmem_limit_bytes=_vmem_limit(2 * block_bytes)),
        cost_estimate=pl.CostEstimate(
            flops=4 * batch * heads * seq * seq * dh,
            transcendentals=batch * heads * seq * seq,
            bytes_accessed=2 * batch * seq * 4 * width),
    )(qkv3)


# --------------------------------------------------------------------------
# Deterministic parameter init (synthetic CLIP-ViT config, small shapes).
# Weights pre-cast to bf16; attention scale folded into Q projection.
# --------------------------------------------------------------------------

def init_params(key, *, in_ch=3, image_size=16, patch=8, width=32,
                layers=2, heads=4, embed_dim=16):
    num_patches = (image_size // patch) ** 2
    seq = num_patches + 1
    dh = width // heads
    attn_scale = 1.0 / math.sqrt(dh)
    scale = 0.02

    def nrm(k, shape):
        return scale * jax.random.normal(k, shape, jnp.float32)

    keys = iter(jax.random.split(key, 8 + 6 * layers))
    params = dict(
        patch=patch, width=width, heads=heads, embed_dim=embed_dim,
        conv_w=nrm(next(keys), (in_ch * patch * patch, width)).astype(jnp.bfloat16),
        class_emb=nrm(next(keys), (width,)),
        pos_emb=nrm(next(keys), (seq, width)),
        ln_pre_g=jnp.ones((width,), jnp.float32),
        ln_pre_b=jnp.zeros((width,), jnp.float32),
        ln_post_g=jnp.ones((width,), jnp.float32),
        ln_post_b=jnp.zeros((width,), jnp.float32),
        vis_proj=nrm(next(keys), (width, embed_dim)).astype(jnp.bfloat16),
        blocks=[],
    )
    # fold 1/sqrt(dh) into the Q columns of the QKV projection (and bias)
    q_scale = jnp.concatenate([jnp.full((width,), attn_scale, jnp.float32),
                               jnp.ones((2 * width,), jnp.float32)])
    for _ in range(layers):
        in_proj_w = nrm(next(keys), (width, 3 * width)) * q_scale[None, :]
        in_proj_b = jnp.zeros((3 * width,), jnp.float32) * q_scale
        params["blocks"].append(dict(
            ln1_g=jnp.ones((width,), jnp.float32),
            ln1_b=jnp.zeros((width,), jnp.float32),
            in_proj_w=in_proj_w.astype(jnp.bfloat16),
            in_proj_b=in_proj_b,
            out_proj_w=nrm(next(keys), (width, width)).astype(jnp.bfloat16),
            out_proj_b=jnp.zeros((width,), jnp.float32),
            ln2_g=jnp.ones((width,), jnp.float32),
            ln2_b=jnp.zeros((width,), jnp.float32),
            fc_w=nrm(next(keys), (width, 4 * width)).astype(jnp.bfloat16),
            fc_b=jnp.zeros((4 * width,), jnp.float32),
            proj_w=nrm(next(keys), (4 * width, width)).astype(jnp.bfloat16),
            proj_b=jnp.zeros((width,), jnp.float32),
        ))
    return params


# --------------------------------------------------------------------------
# Forward pass (== CLIP VisionTransformer.encode_image semantics)
# --------------------------------------------------------------------------

def encode_image(params, images):
    # images: NCHW float32
    B, C, H, W = images.shape
    P = params["patch"]
    width = params["width"]
    heads = params["heads"]
    gh, gw = H // P, W // P
    num_patches = gh * gw

    # patch-embed conv (kernel=stride=P, no bias) == extract patches + matmul
    # TODO(synk): patch-extraction relayout kept in XLA; fusing it into the conv
    #             matmul BlockSpec index_map is possible but low value here.
    patches = images.reshape(B, C, gh, P, gw, P).transpose(0, 2, 4, 1, 3, 5)
    patches = patches.reshape(B * num_patches, C * P * P).astype(jnp.bfloat16)
    x = fused_linear(patches, params["conv_w"],
                     jnp.zeros((width,), jnp.float32))            # (B*np, width) bf16
    x = x.reshape(B, num_patches, width)

    # [CLS] concat + positional embedding + ln_pre fused in one kernel
    x2 = embed_and_ln_pre(x, params["class_emb"], params["pos_emb"],
                          params["ln_pre_g"], params["ln_pre_b"])  # (B, S, width)
    S = num_patches + 1
    x2 = x2.reshape(B * S, width)

    for blk in params["blocks"]:
        # --- MHSA: LN1 fused with the QKV projection ---
        qkv = fused_linear(x2, blk["in_proj_w"], blk["in_proj_b"],
                           ln_gamma=blk["ln1_g"], ln_beta=blk["ln1_b"])
        attn = fused_attention(qkv, batch=B, seq=S, width=width, heads=heads)
        attn = attn.reshape(B * S, width)
        # output projection + residual add fused into one kernel
        x2 = fused_linear(attn, blk["out_proj_w"], blk["out_proj_b"], residual=x2)
        # --- MLP: LN2 + fc + QuickGELU fused; proj + residual fused ---
        h = fused_linear(x2, blk["fc_w"], blk["fc_b"],
                         ln_gamma=blk["ln2_g"], ln_beta=blk["ln2_b"],
                         act="quick_gelu")
        x2 = fused_linear(h, blk["proj_w"], blk["proj_b"], residual=x2)

    cls_out = x2.reshape(B, S, width)[:, 0, :]                     # (B, width)
    # ln_post fused with the final visual projection; f32 features out
    feats = fused_linear(cls_out, params["vis_proj"],
                         jnp.zeros((params["embed_dim"],), jnp.float32),
                         ln_gamma=params["ln_post_g"], ln_beta=params["ln_post_b"],
                         out_dtype=jnp.float32)
    return feats                                                   # (B, embed_dim)


# --------------------------------------------------------------------------

if __name__ == "__main__":
    key = jax.random.PRNGKey(0)
    k_params, k_img = jax.random.split(key)

    params = init_params(k_params, in_ch=3, image_size=16, patch=8,
                         width=32, layers=2, heads=4, embed_dim=16)

    # stand-in for preprocess(Image.open(path)) outputs: NCHW float images
    images = jax.random.normal(k_img, (2, 3, 16, 16), jnp.float32)

    encode = jax.jit(functools.partial(encode_image, params))
    feats = jax.block_until_ready(encode(images))
    assert feats.shape == (2, 16) and feats.dtype == jnp.float32
    assert bool(jnp.all(jnp.isfinite(feats)))
    print("KERNEL_OK")
</pallas_src>

<mosaic_0001>
module attributes {stable_mosaic.version = 11 : i64} {
  func.func @_embed_ln_kernel(%arg0: i32, %arg1: memref<1x4x32xbf16, #tpu.memory_space<vmem>>, %arg2: memref<1x32xf32, #tpu.memory_space<vmem>>, %arg3: memref<5x32xf32, #tpu.memory_space<vmem>>, %arg4: memref<1x32xf32, #tpu.memory_space<vmem>>, %arg5: memref<1x32xf32, #tpu.memory_space<vmem>>, %arg6: memref<1x5x32xbf16, #tpu.memory_space<vmem>>) attributes {dimension_semantics = [#tpu.dimension_semantics<parallel>], iteration_bounds = array<i64: 2>, scalar_prefetch = 0 : i64, scratch_operands = 0 : i64, tpu.core_type = #tpu.core_type<tc>, window_params = [{transform_indices = @transform_0, window_bounds = array<i64: 1, 4, 32>}, {pipeline_mode = #tpu.pipeline_mode<synchronous>, transform_indices = @transform_1, window_bounds = array<i64: 1, 32>}, {pipeline_mode = #tpu.pipeline_mode<synchronous>, transform_indices = @transform_2, window_bounds = array<i64: 5, 32>}, {pipeline_mode = #tpu.pipeline_mode<synchronous>, transform_indices = @transform_3, window_bounds = array<i64: 1, 32>}, {pipeline_mode = #tpu.pipeline_mode<synchronous>, transform_indices = @transform_4, window_bounds = array<i64: 1, 32>}, {transform_indices = @transform_5, window_bounds = array<i64: 1, 5, 32>}]} {
    %c0 = arith.constant 0 : index
    %c0_0 = arith.constant 0 : index
    %c0_1 = arith.constant 0 : index
    %0 = vector.load %arg1[%c0, %c0_0, %c0_1] : memref<1x4x32xbf16, #tpu.memory_space<vmem>>, vector<1x4x32xbf16>
    %1 = vector.shape_cast %0 : vector<1x4x32xbf16> to vector<4x32xbf16>
    %2 = arith.extf %1 : vector<4x32xbf16> to vector<4x32xf32>
    %c0_2 = arith.constant 0 : index
    %c0_3 = arith.constant 0 : index
    %3 = vector.load %arg2[%c0_2, %c0_3] : memref<1x32xf32, #tpu.memory_space<vmem>>, vector<1x32xf32>
    %4 = tpu.concatenate %3, %2 in 0 : vector<1x32xf32>, vector<4x32xf32> -> vector<5x32xf32>
    %c0_4 = arith.constant 0 : index
    %c0_5 = arith.constant 0 : index
    %5 = vector.load %arg3[%c0_4, %c0_5] : memref<5x32xf32, #tpu.memory_space<vmem>>, vector<5x32xf32>
    %6 = arith.addf %4, %5 : vector<5x32xf32>
    %cst = arith.constant dense<0.000000e+00> : vector<5xf32>
    %7 = vector.multi_reduction <add>, %6, %cst [1] : vector<5x32xf32> to vector<5xf32>
    %8 = vector.shape_cast %7 : vector<5xf32> to vector<5x1xf32>
    %cst_6 = arith.constant 3.200000e+01 : f32
    %9 = vector.broadcast %cst_6 : f32 to vector<5x1xf32>
    %10 = arith.divf %8, %9 : vector<5x1xf32>
    %11 = vector.broadcast %10 : vector<5x1xf32> to vector<5x32xf32>
    %12 = arith.subf %6, %11 : vector<5x32xf32>
    %13 = vector.broadcast %10 : vector<5x1xf32> to vector<5x32xf32>
    %14 = arith.subf %6, %13 : vector<5x32xf32>
    %15 = arith.mulf %12, %14 : vector<5x32xf32>
    %cst_7 = arith.constant dense<0.000000e+00> : vector<5xf32>
    %16 = vector.multi_reduction <add>, %15, %cst_7 [1] : vector<5x32xf32> to vector<5xf32>
    %17 = vector.shape_cast %16 : vector<5xf32> to vector<5x1xf32>
    %cst_8 = arith.constant 3.200000e+01 : f32
    %18 = vector.broadcast %cst_8 : f32 to vector<5x1xf32>
    %19 = arith.divf %17, %18 : vector<5x1xf32>
    %20 = vector.broadcast %10 : vector<5x1xf32> to vector<5x32xf32>
    %21 = arith.subf %6, %20 : vector<5x32xf32>
    %cst_9 = arith.constant 9.99999974E-6 : f32
    %22 = vector.broadcast %cst_9 : f32 to vector<5x1xf32>
    %23 = arith.addf %19, %22 : vector<5x1xf32>
    %24 = math.rsqrt %23 : vector<5x1xf32>
    %25 = vector.broadcast %24 : vector<5x1xf32> to vector<5x32xf32>
    %26 = arith.mulf %21, %25 : vector<5x32xf32>
    %c0_10 = arith.constant 0 : index
    %c0_11 = arith.constant 0 : index
    %27 = vector.load %arg4[%c0_10, %c0_11] : memref<1x32xf32, #tpu.memory_space<vmem>>, vector<1x32xf32>
    %28 = vector.broadcast %27 : vector<1x32xf32> to vector<5x32xf32>
    %29 = arith.mulf %26, %28 : vector<5x32xf32>
    %c0_12 = arith.constant 0 : index
    %c0_13 = arith.constant 0 : index
    %30 = vector.load %arg5[%c0_12, %c0_13] : memref<1x32xf32, #tpu.memory_space<vmem>>, vector<1x32xf32>
    %31 = vector.broadcast %30 : vector<1x32xf32> to vector<5x32xf32>
    %32 = arith.addf %29, %31 : vector<5x32xf32>
    %33 = arith.truncf %32 : vector<5x32xf32> to vector<5x32xbf16>
    %c0_14 = arith.constant 0 : index
    %c0_15 = arith.constant 0 : index
    %c0_16 = arith.constant 0 : index
    %34 = vector.load %arg6[%c0_14, %c0_15, %c0_16] : memref<1x5x32xbf16, #tpu.memory_space<vmem>>, vector<1x5x32xbf16>
    %35 = vector.shape_cast %34 : vector<1x5x32xbf16> to vector<5x32xbf16>
    %36 = vector.shape_cast %33 : vector<5x32xbf16> to vector<1x5x32xbf16>
    tpu.vector_store %arg6[%c0_14, %c0_15, %c0_16], %36 {strides = array<i32>} : memref<1x5x32xbf16, #tpu.memory_space<vmem>>, vector<1x5x32xbf16>,
    return
  }
  func.func @transform_0(%arg0: i32) -> (i32, i32, i32) {
    %c0_i32 = arith.constant 0 : i32
    %c0_i32_0 = arith.constant 0 : i32
    %c0_i32_1 = arith.constant 0 : i32
    return %arg0, %c0_i32, %c0_i32_0 : i32, i32, i32
  }
  func.func @transform_1(%arg0: i32) -> (i32, i32) {
    %c0_i32 = arith.constant 0 : i32
    %c0_i32_0 = arith.constant 0 : i32
    %c0_i32_1 = arith.constant 0 : i32
    return %c0_i32, %c0_i32_0 : i32, i32
  }
  func.func @transform_2(%arg0: i32) -> (i32, i32) {
    %c0_i32 = arith.constant 0 : i32
    %c0_i32_0 = arith.constant 0 : i32
    %c0_i32_1 = arith.constant 0 : i32
    return %c0_i32, %c0_i32_0 : i32, i32
  }
  func.func @transform_3(%arg0: i32) -> (i32, i32) {
    %c0_i32 = arith.constant 0 : i32
    %c0_i32_0 = arith.constant 0 : i32
    %c0_i32_1 = arith.constant 0 : i32
    return %c0_i32, %c0_i32_0 : i32, i32
  }
  func.func @transform_4(%arg0: i32) -> (i32, i32) {
    %c0_i32 = arith.constant 0 : i32
    %c0_i32_0 = arith.constant 0 : i32
    %c0_i32_1 = arith.constant 0 : i32
    return %c0_i32, %c0_i32_0 : i32, i32
  }
  func.func @transform_5(%arg0: i32) -> (i32, i32, i32) {
    %c0_i32 = arith.constant 0 : i32
    %c0_i32_0 = arith.constant 0 : i32
    %c0_i32_1 = arith.constant 0 : i32
    return %arg0, %c0_i32, %c0_i32_0 : i32, i32, i32
  }
}

module attributes {stable_mosaic.version = 11 : i64} {
  func.func @kernel(%arg0: i32, %arg1: i32, %arg2: memref<8x192xbf16, #tpu.memory_space<vmem>>, %arg3: memref<192x32xbf16, #tpu.memory_space<vmem>>, %arg4: memref<1x32xf32, #tpu.memory_space<vmem>>, %arg5: memref<8x32xbf16, #tpu.memory_space<vmem>>) attributes {dimension_semantics = [#tpu.dimension_semantics<parallel>, #tpu.dimension_semantics<parallel>], iteration_bounds = array<i64: 1, 1>, scalar_prefetch = 0 : i64, scratch_operands = 0 : i64, tpu.core_type = #tpu.core_type<tc>, window_params = [{transform_indices = @transform_0, window_bounds = array<i64: 8, 192>}, {transform_indices = @transform_1, window_bounds = array<i64: 192, 32>}, {transform_indices = @transform_2, window_bounds = array<i64: 1, 32>}, {transform_indices = @transform_3, window_bounds = array<i64: 8, 32>}]} {
    %c0 = arith.constant 0 : index
    %c0_0 = arith.constant 0 : index
    %0 = vector.load %arg2[%c0, %c0_0] : memref<8x192xbf16, #tpu.memory_space<vmem>>, vector<8x192xbf16>
    %c0_1 = arith.constant 0 : index
    %c0_2 = arith.constant 0 : index
    %1 = vector.load %arg3[%c0_1, %c0_2] : memref<192x32xbf16, #tpu.memory_space<vmem>>, vector<192x32xbf16>
    %cst = arith.constant dense<0.000000e+00> : vector<8x32xf32>
    %2 = tpu.matmul %0, %1, %cst {dimension_numbers = #tpu.dot_dimension_numbers<[1], [0], [0], [1], [0, 0, 1, 1], [], []>} : vector<8x192xbf16>, vector<192x32xbf16>, vector<8x32xf32> -> vector<8x32xf32>
    %c0_3 = arith.constant 0 : index
    %c0_4 = arith.constant 0 : index
    %3 = vector.load %arg4[%c0_3, %c0_4] : memref<1x32xf32, #tpu.memory_space<vmem>>, vector<1x32xf32>
    %4 = vector.broadcast %3 : vector<1x32xf32> to vector<8x32xf32>
    %5 = arith.addf %2, %4 : vector<8x32xf32>
    %6 = arith.truncf %5 : vector<8x32xf32> to vector<8x32xbf16>
    %c0_5 = arith.constant 0 : index
    %c0_6 = arith.constant 0 : index
    %7 = vector.load %arg5[%c0_5, %c0_6] : memref<8x32xbf16, #tpu.memory_space<vmem>>, vector<8x32xbf16>
    tpu.vector_store %arg5[%c0_5, %c0_6], %6 {strides = array<i32>} : memref<8x32xbf16, #tpu.memory_space<vmem>>, vector<8x32xbf16>,
    return
  }
  func.func @transform_0(%arg0: i32, %arg1: i32) -> (i32, i32) {
    %c0_i32 = arith.constant 0 : i32
    %c0_i32_0 = arith.constant 0 : i32
    return %arg0, %c0_i32 : i32, i32
  }
  func.func @transform_1(%arg0: i32, %arg1: i32) -> (i32, i32) {
    %c0_i32 = arith.constant 0 : i32
    %c0_i32_0 = arith.constant 0 : i32
    return %c0_i32, %arg1 : i32, i32
  }
  func.func @transform_2(%arg0: i32, %arg1: i32) -> (i32, i32) {
    %c0_i32 = arith.constant 0 : i32
    %c0_i32_0 = arith.constant 0 : i32
    return %c0_i32, %arg1 : i32, i32
  }
  func.func @transform_3(%arg0: i32, %arg1: i32) -> (i32, i32) {
    %c0_i32 = arith.constant 0 : i32
    return %arg0, %arg1 : i32, i32
  }
}

module attributes {stable_mosaic.version = 11 : i64} {
  func.func @_attention_kernel(%arg0: i32, %arg1: memref<1x5x96xbf16, #tpu.memory_space<vmem>>, %arg2: memref<1x5x32xbf16, #tpu.memory_space<vmem>>) attributes {dimension_semantics = [#tpu.dimension_semantics<parallel>], iteration_bounds = array<i64: 2>, scalar_prefetch = 0 : i64, scratch_operands = 0 : i64, tpu.core_type = #tpu.core_type<tc>, window_params = [{transform_indices = @transform_0, window_bounds = array<i64: 1, 5, 96>}, {transform_indices = @transform_1, window_bounds = array<i64: 1, 5, 32>}]} {
    %c0 = arith.constant 0 : index
    %c0_0 = arith.constant 0 : index
    %c0_1 = arith.constant 0 : index
    %0 = vector.load %arg1[%c0, %c0_0, %c0_1] : memref<1x5x96xbf16, #tpu.memory_space<vmem>>, vector<1x5x96xbf16>
    %1 = vector.shape_cast %0 : vector<1x5x96xbf16> to vector<5x96xbf16>
    %2 = vector.extract_strided_slice %1 {offsets = [0, 0], sizes = [5, 8], strides = [1, 1]} : vector<5x96xbf16> to vector<5x8xbf16>
    %3 = vector.extract_strided_slice %1 {offsets = [0, 8], sizes = [5, 8], strides = [1, 1]} : vector<5x96xbf16> to vector<5x8xbf16>
    %4 = vector.extract_strided_slice %1 {offsets = [0, 16], sizes = [5, 8], strides = [1, 1]} : vector<5x96xbf16> to vector<5x8xbf16>
    %5 = vector.extract_strided_slice %1 {offsets = [0, 24], sizes = [5, 8], strides = [1, 1]} : vector<5x96xbf16> to vector<5x8xbf16>
    %6 = vector.shape_cast %2 : vector<5x8xbf16> to vector<1x5x8xbf16>
    %7 = vector.shape_cast %3 : vector<5x8xbf16> to vector<1x5x8xbf16>
    %8 = vector.shape_cast %4 : vector<5x8xbf16> to vector<1x5x8xbf16>
    %9 = vector.shape_cast %5 : vector<5x8xbf16> to vector<1x5x8xbf16>
    %10 = tpu.concatenate %6, %7, %8, %9 in 0 : vector<1x5x8xbf16>, vector<1x5x8xbf16>, vector<1x5x8xbf16>, vector<1x5x8xbf16> -> vector<4x5x8xbf16>
    %11 = vector.extract_strided_slice %1 {offsets = [0, 32], sizes = [5, 8], strides = [1, 1]} : vector<5x96xbf16> to vector<5x8xbf16>
    %12 = vector.extract_strided_slice %1 {offsets = [0, 40], sizes = [5, 8], strides = [1, 1]} : vector<5x96xbf16> to vector<5x8xbf16>
    %13 = vector.extract_strided_slice %1 {offsets = [0, 48], sizes = [5, 8], strides = [1, 1]} : vector<5x96xbf16> to vector<5x8xbf16>
    %14 = vector.extract_strided_slice %1 {offsets = [0, 56], sizes = [5, 8], strides = [1, 1]} : vector<5x96xbf16> to vector<5x8xbf16>
    %15 = vector.shape_cast %11 : vector<5x8xbf16> to vector<1x5x8xbf16>
    %16 = vector.shape_cast %12 : vector<5x8xbf16> to vector<1x5x8xbf16>
    %17 = vector.shape_cast %13 : vector<5x8xbf16> to vector<1x5x8xbf16>
    %18 = vector.shape_cast %14 : vector<5x8xbf16> to vector<1x5x8xbf16>
    %19 = tpu.concatenate %15, %16, %17, %18 in 0 : vector<1x5x8xbf16>, vector<1x5x8xbf16>, vector<1x5x8xbf16>, vector<1x5x8xbf16> -> vector<4x5x8xbf16>
    %20 = vector.extract_strided_slice %1 {offsets = [0, 64], sizes = [5, 8], strides = [1, 1]} : vector<5x96xbf16> to vector<5x8xbf16>
    %21 = vector.extract_strided_slice %1 {offsets = [0, 72], sizes = [5, 8], strides = [1, 1]} : vector<5x96xbf16> to vector<5x8xbf16>
    %22 = vector.extract_strided_slice %1 {offsets = [0, 80], sizes = [5, 8], strides = [1, 1]} : vector<5x96xbf16> to vector<5x8xbf16>
    %23 = vector.extract_strided_slice %1 {offsets = [0, 88], sizes = [5, 8], strides = [1, 1]} : vector<5x96xbf16> to vector<5x8xbf16>
    %24 = vector.shape_cast %20 : vector<5x8xbf16> to vector<1x5x8xbf16>
    %25 = vector.shape_cast %21 : vector<5x8xbf16> to vector<1x5x8xbf16>
    %26 = vector.shape_cast %22 : vector<5x8xbf16> to vector<1x5x8xbf16>
    %27 = vector.shape_cast %23 : vector<5x8xbf16> to vector<1x5x8xbf16>
    %28 = tpu.concatenate %24, %25, %26, %27 in 0 : vector<1x5x8xbf16>, vector<1x5x8xbf16>, vector<1x5x8xbf16>, vector<1x5x8xbf16> -> vector<4x5x8xbf16>
    %cst = arith.constant dense<0.000000e+00> : vector<4x5x5xf32>
    %29 = tpu.matmul %10, %19, %cst {dimension_numbers = #tpu.dot_dimension_numbers<[2], [2], [1], [1], [0, 0, 0, 1, 1, 1], [0], [0]>} : vector<4x5x8xbf16>, vector<4x5x8xbf16>, vector<4x5x5xf32> -> vector<4x5x5xf32>
    %cst_2 = arith.constant dense<0xFF800000> : vector<4x5xf32>
    %30 = vector.multi_reduction <maximumf>, %29, %cst_2 [2] : vector<4x5x5xf32> to vector<4x5xf32>
    %31 = vector.shape_cast %30 : vector<4x5xf32> to vector<4x5x1xf32>
    %32 = vector.broadcast %31 : vector<4x5x1xf32> to vector<4x5x5xf32>
    %33 = arith.subf %29, %32 : vector<4x5x5xf32>
    %34 = math.exp %33 : vector<4x5x5xf32>
    %cst_3 = arith.constant dense<0.000000e+00> : vector<4x5xf32>
    %35 = vector.multi_reduction <add>, %34, %cst_3 [2] : vector<4x5x5xf32> to vector<4x5xf32>
    %36 = vector.shape_cast %35 : vector<4x5xf32> to vector<4x5x1xf32>
    %37 = tpu.reciprocal %36 {approx = true} : vector<4x5x1xf32> -> vector<4x5x1xf32>
    %38 = vector.broadcast %37 : vector<4x5x1xf32> to vector<4x5x5xf32>
    %39 = arith.mulf %34, %38 : vector<4x5x5xf32>
    %40 = arith.truncf %39 : vector<4x5x5xf32> to vector<4x5x5xbf16>
    %cst_4 = arith.constant dense<0.000000e+00> : vector<4x5x8xf32>
    %41 = tpu.matmul %40, %28, %cst_4 {dimension_numbers = #tpu.dot_dimension_numbers<[2], [1], [1], [2], [0, 0, 0, 1, 1, 2], [0], [0]>} : vector<4x5x5xbf16>, vector<4x5x8xbf16>, vector<4x5x8xf32> -> vector<4x5x8xf32>
    %42 = vector.extract_strided_slice %41 {offsets = [0, 0, 0], sizes = [1, 5, 8], strides = [1, 1, 1]} : vector<4x5x8xf32> to vector<1x5x8xf32>
    %43 = vector.shape_cast %42 : vector<1x5x8xf32> to vector<5x8xf32>
    %44 = vector.extract_strided_slice %41 {offsets = [1, 0, 0], sizes = [1, 5, 8], strides = [1, 1, 1]} : vector<4x5x8xf32> to vector<1x5x8xf32>
    %45 = vector.shape_cast %44 : vector<1x5x8xf32> to vector<5x8xf32>
    %46 = vector.extract_strided_slice %41 {offsets = [2, 0, 0], sizes = [1, 5, 8], strides = [1, 1, 1]} : vector<4x5x8xf32> to vector<1x5x8xf32>
    %47 = vector.shape_cast %46 : vector<1x5x8xf32> to vector<5x8xf32>
    %48 = vector.extract_strided_slice %41 {offsets = [3, 0, 0], sizes = [1, 5, 8], strides = [1, 1, 1]} : vector<4x5x8xf32> to vector<1x5x8xf32>
    %49 = vector.shape_cast %48 : vector<1x5x8xf32> to vector<5x8xf32>
    %50 = tpu.concatenate %43, %45, %47, %49 in 1 : vector<5x8xf32>, vector<5x8xf32>, vector<5x8xf32>, vector<5x8xf32> -> vector<5x32xf32>
    %51 = arith.truncf %50 : vector<5x32xf32> to vector<5x32xbf16>
    %c0_5 = arith.constant 0 : index
    %c0_6 = arith.constant 0 : index
    %c0_7 = arith.constant 0 : index
    %52 = vector.load %arg2[%c0_5, %c0_6, %c0_7] : memref<1x5x32xbf16, #tpu.memory_space<vmem>>, vector<1x5x32xbf16>
    %53 = vector.shape_cast %52 : vector<1x5x32xbf16> to vector<5x32xbf16>
    %54 = vector.shape_cast %51 : vector<5x32xbf16> to vector<1x5x32xbf16>
    tpu.vector_store %arg2[%c0_5, %c0_6, %c0_7], %54 {strides = array<i32>} : memref<1x5x32xbf16, #tpu.memory_space<vmem>>, vector<1x5x32xbf16>,
    return
  }
  func.func @transform_0(%arg0: i32) -> (i32, i32, i32) {
    %c0_i32 = arith.constant 0 : i32
    %c0_i32_0 = arith.constant 0 : i32
    %c0_i32_1 = arith.constant 0 : i32
    return %arg0, %c0_i32, %c0_i32_0 : i32, i32, i32
  }
  func.func @transform_1(%arg0: i32) -> (i32, i32, i32) {
    %c0_i32 = arith.constant 0 : i32
    %c0_i32_0 = arith.constant 0 : i32
    %c0_i32_1 = arith.constant 0 : i32
    return %arg0, %c0_i32, %c0_i32_0 : i32, i32, i32
  }
}

module attributes {stable_mosaic.version = 11 : i64} {
  func.func @kernel(%arg0: i32, %arg1: i32, %arg2: memref<10x32xbf16, #tpu.memory_space<vmem>>, %arg3: memref<1x32xf32, #tpu.memory_space<vmem>>, %arg4: memref<1x32xf32, #tpu.memory_space<vmem>>, %arg5: memref<32x96xbf16, #tpu.memory_space<vmem>>, %arg6: memref<1x96xf32, #tpu.memory_space<vmem>>, %arg7: memref<10x96xbf16, #tpu.memory_space<vmem>>, %arg8: memref<10x32xbf16, #tpu.memory_space<vmem>>) attributes {dimension_semantics = [#tpu.dimension_semantics<parallel>, #tpu.dimension_semantics<arbitrary>], iteration_bounds = array<i64: 1, 1>, scalar_prefetch = 0 : i64, scratch_operands = 1 : i64, tpu.core_type = #tpu.core_type<tc>, window_params = [{transform_indices = @transform_0, window_bounds = array<i64: 10, 32>}, {pipeline_mode = #tpu.pipeline_mode<synchronous>, transform_indices = @transform_1, window_bounds = array<i64: 1, 32>}, {pipeline_mode = #tpu.pipeline_mode<synchronous>, transform_indices = @transform_2, window_bounds = array<i64: 1, 32>}, {transform_indices = @transform_3, window_bounds = array<i64: 32, 96>}, {transform_indices = @transform_4, window_bounds = array<i64: 1, 96>}, {transform_indices = @transform_5, window_bounds = array<i64: 10, 96>}]} {
    %c0_i32 = arith.constant 0 : i32
    %0 = arith.cmpi eq, %arg1, %c0_i32 : i32
    %1 = arith.extui %0 : i1 to i32
    %c0_i32_0 = arith.constant 0 : i32
    %2 = arith.cmpi ne, %1, %c0_i32_0 : i32
    scf.if %2 {
      %c0_8 = arith.constant 0 : index
      %c0_9 = arith.constant 0 : index
      %11 = vector.load %arg2[%c0_8, %c0_9] : memref<10x32xbf16, #tpu.memory_space<vmem>>, vector<10x32xbf16>
      %12 = arith.extf %11 : vector<10x32xbf16> to vector<10x32xf32>
      %cst_10 = arith.constant dense<0.000000e+00> : vector<10xf32>
      %13 = vector.multi_reduction <add>, %12, %cst_10 [1] : vector<10x32xf32> to vector<10xf32>
      %14 = vector.shape_cast %13 : vector<10xf32> to vector<10x1xf32>
      %cst_11 = arith.constant 3.200000e+01 : f32
      %15 = vector.broadcast %cst_11 : f32 to vector<10x1xf32>
      %16 = arith.divf %14, %15 : vector<10x1xf32>
      %17 = vector.broadcast %16 : vector<10x1xf32> to vector<10x32xf32>
      %18 = arith.subf %12, %17 : vector<10x32xf32>
      %19 = vector.broadcast %16 : vector<10x1xf32> to vector<10x32xf32>
      %20 = arith.subf %12, %19 : vector<10x32xf32>
      %21 = arith.mulf %18, %20 : vector<10x32xf32>
      %cst_12 = arith.constant dense<0.000000e+00> : vector<10xf32>
      %22 = vector.multi_reduction <add>, %21, %cst_12 [1] : vector<10x32xf32> to vector<10xf32>
      %23 = vector.shape_cast %22 : vector<10xf32> to vector<10x1xf32>
      %cst_13 = arith.constant 3.200000e+01 : f32
      %24 = vector.broadcast %cst_13 : f32 to vector<10x1xf32>
      %25 = arith.divf %23, %24 : vector<10x1xf32>
      %26 = vector.broadcast %16 : vector<10x1xf32> to vector<10x32xf32>
      %27 = arith.subf %12, %26 : vector<10x32xf32>
      %cst_14 = arith.constant 9.99999974E-6 : f32
      %28 = vector.broadcast %cst_14 : f32 to vector<10x1xf32>
      %29 = arith.addf %25, %28 : vector<10x1xf32>
      %30 = math.rsqrt %29 : vector<10x1xf32>
      %31 = vector.broadcast %30 : vector<10x1xf32> to vector<10x32xf32>
      %32 = arith.mulf %27, %31 : vector<10x32xf32>
      %c0_15 = arith.constant 0 : index
      %c0_16 = arith.constant 0 : index
      %33 = vector.load %arg3[%c0_15, %c0_16] : memref<1x32xf32, #tpu.memory_space<vmem>>, vector<1x32xf32>
      %34 = vector.broadcast %33 : vector<1x32xf32> to vector<10x32xf32>
      %35 = arith.mulf %32, %34 : vector<10x32xf32>
      %c0_17 = arith.constant 0 : index
      %c0_18 = arith.constant 0 : index
      %36 = vector.load %arg4[%c0_17, %c0_18] : memref<1x32xf32, #tpu.memory_space<vmem>>, vector<1x32xf32>
      %37 = vector.broadcast %36 : vector<1x32xf32> to vector<10x32xf32>
      %38 = arith.addf %35, %37 : vector<10x32xf32>
      %39 = arith.truncf %38 : vector<10x32xf32> to vector<10x32xbf16>
      %c0_19 = arith.constant 0 : index
      %c0_20 = arith.constant 0 : index
      %40 = vector.load %arg8[%c0_19, %c0_20] : memref<10x32xbf16, #tpu.memory_space<vmem>>, vector<10x32xbf16>
      tpu.vector_store %arg8[%c0_19, %c0_20], %39 {strides = array<i32>} : memref<10x32xbf16, #tpu.memory_space<vmem>>, vector<10x32xbf16>,
    } else {
    }
    %c0 = arith.constant 0 : index
    %c0_1 = arith.constant 0 : index
    %3 = vector.load %arg8[%c0, %c0_1] : memref<10x32xbf16, #tpu.memory_space<vmem>>, vector<10x32xbf16>
    %c0_2 = arith.constant 0 : index
    %c0_3 = arith.constant 0 : index
    %4 = vector.load %arg5[%c0_2, %c0_3] : memref<32x96xbf16, #tpu.memory_space<vmem>>, vector<32x96xbf16>
    %cst = arith.constant dense<0.000000e+00> : vector<10x96xf32>
    %5 = tpu.matmul %3, %4, %cst {dimension_numbers = #tpu.dot_dimension_numbers<[1], [0], [0], [1], [0, 0, 1, 1], [], []>} : vector<10x32xbf16>, vector<32x96xbf16>, vector<10x96xf32> -> vector<10x96xf32>
    %c0_4 = arith.constant 0 : index
    %c0_5 = arith.constant 0 : index
    %6 = vector.load %arg6[%c0_4, %c0_5] : memref<1x96xf32, #tpu.memory_space<vmem>>, vector<1x96xf32>
    %7 = vector.broadcast %6 : vector<1x96xf32> to vector<10x96xf32>
    %8 = arith.addf %5, %7 : vector<10x96xf32>
    %9 = arith.truncf %8 : vector<10x96xf32> to vector<10x96xbf16>
    %c0_6 = arith.constant 0 : index
    %c0_7 = arith.constant 0 : index
    %10 = vector.load %arg7[%c0_6, %c0_7] : memref<10x96xbf16, #tpu.memory_space<vmem>>, vector<10x96xbf16>
    tpu.vector_store %arg7[%c0_6, %c0_7], %9 {strides = array<i32>} : memref<10x96xbf16, #tpu.memory_space<vmem>>, vector<10x96xbf16>,
    return
  }
  func.func @transform_0(%arg0: i32, %arg1: i32) -> (i32, i32) {
    %c0_i32 = arith.constant 0 : i32
    %c0_i32_0 = arith.constant 0 : i32
    return %arg0, %c0_i32 : i32, i32
  }
  func.func @transform_1(%arg0: i32, %arg1: i32) -> (i32, i32) {
    %c0_i32 = arith.constant 0 : i32
    %c0_i32_0 = arith.constant 0 : i32
    %c0_i32_1 = arith.constant 0 : i32
    return %c0_i32, %c0_i32_0 : i32, i32
  }
  func.func @transform_2(%arg0: i32, %arg1: i32) -> (i32, i32) {
    %c0_i32 = arith.constant 0 : i32
    %c0_i32_0 = arith.constant 0 : i32
    %c0_i32_1 = arith.constant 0 : i32
    return %c0_i32, %c0_i32_0 : i32, i32
  }
  func.func @transform_3(%arg0: i32, %arg1: i32) -> (i32, i32) {
    %c0_i32 = arith.constant 0 : i32
    %c0_i32_0 = arith.constant 0 : i32
    return %c0_i32, %arg1 : i32, i32
  }
  func.func @transform_4(%arg0: i32, %arg1: i32) -> (i32, i32) {
    %c0_i32 = arith.constant 0 : i32
    %c0_i32_0 = arith.constant 0 : i32
    return %c0_i32, %arg1 : i32, i32
  }
  func.func @transform_5(%arg0: i32, %arg1: i32) -> (i32, i32) {
    %c0_i32 = arith.constant 0 : i32
    return %arg0, %arg1 : i32, i32
  }
}

module attributes {stable_mosaic.version = 11 : i64} {
  func.func @kernel(%arg0: i32, %arg1: i32, %arg2: memref<10x32xbf16, #tpu.memory_space<vmem>>, %arg3: memref<32x32xbf16, #tpu.memory_space<vmem>>, %arg4: memref<1x32xf32, #tpu.memory_space<vmem>>, %arg5: memref<10x32xbf16, #tpu.memory_space<vmem>>, %arg6: memref<10x32xbf16, #tpu.memory_space<vmem>>) attributes {dimension_semantics = [#tpu.dimension_semantics<parallel>, #tpu.dimension_semantics<parallel>], iteration_bounds = array<i64: 1, 1>, scalar_prefetch = 0 : i64, scratch_operands = 0 : i64, tpu.core_type = #tpu.core_type<tc>, window_params = [{transform_indices = @transform_0, window_bounds = array<i64: 10, 32>}, {transform_indices = @transform_1, window_bounds = array<i64: 32, 32>}, {transform_indices = @transform_2, window_bounds = array<i64: 1, 32>}, {transform_indices = @transform_3, window_bounds = array<i64: 10, 32>}, {transform_indices = @transform_4, window_bounds = array<i64: 10, 32>}]} {
    %c0 = arith.constant 0 : index
    %c0_0 = arith.constant 0 : index
    %0 = vector.load %arg2[%c0, %c0_0] : memref<10x32xbf16, #tpu.memory_space<vmem>>, vector<10x32xbf16>
    %c0_1 = arith.constant 0 : index
    %c0_2 = arith.constant 0 : index
    %1 = vector.load %arg3[%c0_1, %c0_2] : memref<32x32xbf16, #tpu.memory_space<vmem>>, vector<32x32xbf16>
    %cst = arith.constant dense<0.000000e+00> : vector<10x32xf32>
    %2 = tpu.matmul %0, %1, %cst {dimension_numbers = #tpu.dot_dimension_numbers<[1], [0], [0], [1], [0, 0, 1, 1], [], []>} : vector<10x32xbf16>, vector<32x32xbf16>, vector<10x32xf32> -> vector<10x32xf32>
    %c0_3 = arith.constant 0 : index
    %c0_4 = arith.constant 0 : index
    %3 = vector.load %arg4[%c0_3, %c0_4] : memref<1x32xf32, #tpu.memory_space<vmem>>, vector<1x32xf32>
    %4 = vector.broadcast %3 : vector<1x32xf32> to vector<10x32xf32>
    %5 = arith.addf %2, %4 : vector<10x32xf32>
    %c0_5 = arith.constant 0 : index
    %c0_6 = arith.constant 0 : index
    %6 = vector.load %arg5[%c0_5, %c0_6] : memref<10x32xbf16, #tpu.memory_space<vmem>>, vector<10x32xbf16>
    %7 = arith.extf %6 : vector<10x32xbf16> to vector<10x32xf32>
    %8 = arith.addf %5, %7 : vector<10x32xf32>
    %9 = arith.truncf %8 : vector<10x32xf32> to vector<10x32xbf16>
    %c0_7 = arith.constant 0 : index
    %c0_8 = arith.constant 0 : index
    %10 = vector.load %arg6[%c0_7, %c0_8] : memref<10x32xbf16, #tpu.memory_space<vmem>>, vector<10x32xbf16>
    tpu.vector_store %arg6[%c0_7, %c0_8], %9 {strides = array<i32>} : memref<10x32xbf16, #tpu.memory_space<vmem>>, vector<10x32xbf16>,
    return
  }
  func.func @transform_0(%arg0: i32, %arg1: i32) -> (i32, i32) {
    %c0_i32 = arith.constant 0 : i32
    %c0_i32_0 = arith.constant 0 : i32
    return %arg0, %c0_i32 : i32, i32
  }
  func.func @transform_1(%arg0: i32, %arg1: i32) -> (i32, i32) {
    %c0_i32 = arith.constant 0 : i32
    %c0_i32_0 = arith.constant 0 : i32
    return %c0_i32, %arg1 : i32, i32
  }
  func.func @transform_2(%arg0: i32, %arg1: i32) -> (i32, i32) {
    %c0_i32 = arith.constant 0 : i32
    %c0_i32_0 = arith.constant 0 : i32
    return %c0_i32, %arg1 : i32, i32
  }
  func.func @transform_3(%arg0: i32, %arg1: i32) -> (i32, i32) {
    %c0_i32 = arith.constant 0 : i32
    return %arg0, %arg1 : i32, i32
  }
  func.func @transform_4(%arg0: i32, %arg1: i32) -> (i32, i32) {
    %c0_i32 = arith.constant 0 : i32
    return %arg0, %arg1 : i32, i32
  }
}

module attributes {stable_mosaic.version = 11 : i64} {
  func.func @kernel(%arg0: i32, %arg1: i32, %arg2: memref<10x32xbf16, #tpu.memory_space<vmem>>, %arg3: memref<1x32xf32, #tpu.memory_space<vmem>>, %arg4: memref<1x32xf32, #tpu.memory_space<vmem>>, %arg5: memref<32x128xbf16, #tpu.memory_space<vmem>>, %arg6: memref<1x128xf32, #tpu.memory_space<vmem>>, %arg7: memref<10x128xbf16, #tpu.memory_space<vmem>>, %arg8: memref<10x32xbf16, #tpu.memory_space<vmem>>) attributes {dimension_semantics = [#tpu.dimension_semantics<parallel>, #tpu.dimension_semantics<arbitrary>], iteration_bounds = array<i64: 1, 1>, scalar_prefetch = 0 : i64, scratch_operands = 1 : i64, tpu.core_type = #tpu.core_type<tc>, window_params = [{transform_indices = @transform_0, window_bounds = array<i64: 10, 32>}, {pipeline_mode = #tpu.pipeline_mode<synchronous>, transform_indices = @transform_1, window_bounds = array<i64: 1, 32>}, {pipeline_mode = #tpu.pipeline_mode<synchronous>, transform_indices = @transform_2, window_bounds = array<i64: 1, 32>}, {transform_indices = @transform_3, window_bounds = array<i64: 32, 128>}, {transform_indices = @transform_4, window_bounds = array<i64: 1, 128>}, {transform_indices = @transform_5, window_bounds = array<i64: 10, 128>}]} {
    %c0_i32 = arith.constant 0 : i32
    %0 = arith.cmpi eq, %arg1, %c0_i32 : i32
    %1 = arith.extui %0 : i1 to i32
    %c0_i32_0 = arith.constant 0 : i32
    %2 = arith.cmpi ne, %1, %c0_i32_0 : i32
    scf.if %2 {
      %c0_10 = arith.constant 0 : index
      %c0_11 = arith.constant 0 : index
      %19 = vector.load %arg2[%c0_10, %c0_11] : memref<10x32xbf16, #tpu.memory_space<vmem>>, vector<10x32xbf16>
      %20 = arith.extf %19 : vector<10x32xbf16> to vector<10x32xf32>
      %cst_12 = arith.constant dense<0.000000e+00> : vector<10xf32>
      %21 = vector.multi_reduction <add>, %20, %cst_12 [1] : vector<10x32xf32> to vector<10xf32>
      %22 = vector.shape_cast %21 : vector<10xf32> to vector<10x1xf32>
      %cst_13 = arith.constant 3.200000e+01 : f32
      %23 = vector.broadcast %cst_13 : f32 to vector<10x1xf32>
      %24 = arith.divf %22, %23 : vector<10x1xf32>
      %25 = vector.broadcast %24 : vector<10x1xf32> to vector<10x32xf32>
      %26 = arith.subf %20, %25 : vector<10x32xf32>
      %27 = vector.broadcast %24 : vector<10x1xf32> to vector<10x32xf32>
      %28 = arith.subf %20, %27 : vector<10x32xf32>
      %29 = arith.mulf %26, %28 : vector<10x32xf32>
      %cst_14 = arith.constant dense<0.000000e+00> : vector<10xf32>
      %30 = vector.multi_reduction <add>, %29, %cst_14 [1] : vector<10x32xf32> to vector<10xf32>
      %31 = vector.shape_cast %30 : vector<10xf32> to vector<10x1xf32>
      %cst_15 = arith.constant 3.200000e+01 : f32
      %32 = vector.broadcast %cst_15 : f32 to vector<10x1xf32>
      %33 = arith.divf %31, %32 : vector<10x1xf32>
      %34 = vector.broadcast %24 : vector<10x1xf32> to vector<10x32xf32>
      %35 = arith.subf %20, %34 : vector<10x32xf32>
      %cst_16 = arith.constant 9.99999974E-6 : f32
      %36 = vector.broadcast %cst_16 : f32 to vector<10x1xf32>
      %37 = arith.addf %33, %36 : vector<10x1xf32>
      %38 = math.rsqrt %37 : vector<10x1xf32>
      %39 = vector.broadcast %38 : vector<10x1xf32> to vector<10x32xf32>
      %40 = arith.mulf %35, %39 : vector<10x32xf32>
      %c0_17 = arith.constant 0 : index
      %c0_18 = arith.constant 0 : index
      %41 = vector.load %arg3[%c0_17, %c0_18] : memref<1x32xf32, #tpu.memory_space<vmem>>, vector<1x32xf32>
      %42 = vector.broadcast %41 : vector<1x32xf32> to vector<10x32xf32>
      %43 = arith.mulf %40, %42 : vector<10x32xf32>
      %c0_19 = arith.constant 0 : index
      %c0_20 = arith.constant 0 : index
      %44 = vector.load %arg4[%c0_19, %c0_20] : memref<1x32xf32, #tpu.memory_space<vmem>>, vector<1x32xf32>
      %45 = vector.broadcast %44 : vector<1x32xf32> to vector<10x32xf32>
      %46 = arith.addf %43, %45 : vector<10x32xf32>
      %47 = arith.truncf %46 : vector<10x32xf32> to vector<10x32xbf16>
      %c0_21 = arith.constant 0 : index
      %c0_22 = arith.constant 0 : index
      %48 = vector.load %arg8[%c0_21, %c0_22] : memref<10x32xbf16, #tpu.memory_space<vmem>>, vector<10x32xbf16>
      tpu.vector_store %arg8[%c0_21, %c0_22], %47 {strides = array<i32>} : memref<10x32xbf16, #tpu.memory_space<vmem>>, vector<10x32xbf16>,
    } else {
    }
    %c0 = arith.constant 0 : index
    %c0_1 = arith.constant 0 : index
    %3 = vector.load %arg8[%c0, %c0_1] : memref<10x32xbf16, #tpu.memory_space<vmem>>, vector<10x32xbf16>
    %c0_2 = arith.constant 0 : index
    %c0_3 = arith.constant 0 : index
    %4 = vector.load %arg5[%c0_2, %c0_3] : memref<32x128xbf16, #tpu.memory_space<vmem>>, vector<32x128xbf16>
    %cst = arith.constant dense<0.000000e+00> : vector<10x128xf32>
    %5 = tpu.matmul %3, %4, %cst {dimension_numbers = #tpu.dot_dimension_numbers<[1], [0], [0], [1], [0, 0, 1, 1], [], []>} : vector<10x32xbf16>, vector<32x128xbf16>, vector<10x128xf32> -> vector<10x128xf32>
    %c0_4 = arith.constant 0 : index
    %c0_5 = arith.constant 0 : index
    %6 = vector.load %arg6[%c0_4, %c0_5] : memref<1x128xf32, #tpu.memory_space<vmem>>, vector<1x128xf32>
    %7 = vector.broadcast %6 : vector<1x128xf32> to vector<10x128xf32>
    %8 = arith.addf %5, %7 : vector<10x128xf32>
    %cst_6 = arith.constant 1.702000e+00 : f32
    %9 = vector.broadcast %cst_6 : f32 to vector<10x128xf32>
    %10 = arith.mulf %9, %8 : vector<10x128xf32>
    %11 = arith.negf %10 : vector<10x128xf32>
    %12 = math.exp %11 : vector<10x128xf32>
    %cst_7 = arith.constant 1.000000e+00 : f32
    %13 = vector.broadcast %cst_7 : f32 to vector<10x128xf32>
    %14 = arith.addf %13, %12 : vector<10x128xf32>
    %15 = arith.divf %13, %14 : vector<10x128xf32>
    %16 = arith.mulf %8, %15 : vector<10x128xf32>
    %17 = arith.truncf %16 : vector<10x128xf32> to vector<10x128xbf16>
    %c0_8 = arith.constant 0 : index
    %c0_9 = arith.constant 0 : index
    %18 = vector.load %arg7[%c0_8, %c0_9] : memref<10x128xbf16, #tpu.memory_space<vmem>>, vector<10x128xbf16>
    tpu.vector_store %arg7[%c0_8, %c0_9], %17 {strides = array<i32>} : memref<10x128xbf16, #tpu.memory_space<vmem>>, vector<10x128xbf16>,
    return
  }
  func.func @transform_0(%arg0: i32, %arg1: i32) -> (i32, i32) {
    %c0_i32 = arith.constant 0 : i32
    %c0_i32_0 = arith.constant 0 : i32
    return %arg0, %c0_i32 : i32, i32
  }
  func.func @transform_1(%arg0: i32, %arg1: i32) -> (i32, i32) {
    %c0_i32 = arith.constant 0 : i32
    %c0_i32_0 = arith.constant 0 : i32
    %c0_i32_1 = arith.constant 0 : i32
    return %c0_i32, %c0_i32_0 : i32, i32
  }
  func.func @transform_2(%arg0: i32, %arg1: i32) -> (i32, i32) {
    %c0_i32 = arith.constant 0 : i32
    %c0_i32_0 = arith.constant 0 : i32
    %c0_i32_1 = arith.constant 0 : i32
    return %c0_i32, %c0_i32_0 : i32, i32
  }
  func.func @transform_3(%arg0: i32, %arg1: i32) -> (i32, i32) {
    %c0_i32 = arith.constant 0 : i32
    %c0_i32_0 = arith.constant 0 : i32
    return %c0_i32, %arg1 : i32, i32
  }
  func.func @transform_4(%arg0: i32, %arg1: i32) -> (i32, i32) {
    %c0_i32 = arith.constant 0 : i32
    %c0_i32_0 = arith.constant 0 : i32
    return %c0_i32, %arg1 : i32, i32
  }
  func.func @transform_5(%arg0: i32, %arg1: i32) -> (i32, i32) {
    %c0_i32 = arith.constant 0 : i32
    return %arg0, %arg1 : i32, i32
  }
}

module attributes {stable_mosaic.version = 11 : i64} {
  func.func @kernel(%arg0: i32, %arg1: i32, %arg2: memref<10x128xbf16, #tpu.memory_space<vmem>>, %arg3: memref<128x32xbf16, #tpu.memory_space<vmem>>, %arg4: memref<1x32xf32, #tpu.memory_space<vmem>>, %arg5: memref<10x32xbf16, #tpu.memory_space<vmem>>, %arg6: memref<10x32xbf16, #tpu.memory_space<vmem>>) attributes {dimension_semantics = [#tpu.dimension_semantics<parallel>, #tpu.dimension_semantics<parallel>], iteration_bounds = array<i64: 1, 1>, scalar_prefetch = 0 : i64, scratch_operands = 0 : i64, tpu.core_type = #tpu.core_type<tc>, window_params = [{transform_indices = @transform_0, window_bounds = array<i64: 10, 128>}, {transform_indices = @transform_1, window_bounds = array<i64: 128, 32>}, {transform_indices = @transform_2, window_bounds = array<i64: 1, 32>}, {transform_indices = @transform_3, window_bounds = array<i64: 10, 32>}, {transform_indices = @transform_4, window_bounds = array<i64: 10, 32>}]} {
    %c0 = arith.constant 0 : index
    %c0_0 = arith.constant 0 : index
    %0 = vector.load %arg2[%c0, %c0_0] : memref<10x128xbf16, #tpu.memory_space<vmem>>, vector<10x128xbf16>
    %c0_1 = arith.constant 0 : index
    %c0_2 = arith.constant 0 : index
    %1 = vector.load %arg3[%c0_1, %c0_2] : memref<128x32xbf16, #tpu.memory_space<vmem>>, vector<128x32xbf16>
    %cst = arith.constant dense<0.000000e+00> : vector<10x32xf32>
    %2 = tpu.matmul %0, %1, %cst {dimension_numbers = #tpu.dot_dimension_numbers<[1], [0], [0], [1], [0, 0, 1, 1], [], []>} : vector<10x128xbf16>, vector<128x32xbf16>, vector<10x32xf32> -> vector<10x32xf32>
    %c0_3 = arith.constant 0 : index
    %c0_4 = arith.constant 0 : index
    %3 = vector.load %arg4[%c0_3, %c0_4] : memref<1x32xf32, #tpu.memory_space<vmem>>, vector<1x32xf32>
    %4 = vector.broadcast %3 : vector<1x32xf32> to vector<10x32xf32>
    %5 = arith.addf %2, %4 : vector<10x32xf32>
    %c0_5 = arith.constant 0 : index
    %c0_6 = arith.constant 0 : index
    %6 = vector.load %arg5[%c0_5, %c0_6] : memref<10x32xbf16, #tpu.memory_space<vmem>>, vector<10x32xbf16>
    %7 = arith.extf %6 : vector<10x32xbf16> to vector<10x32xf32>
    %8 = arith.addf %5, %7 : vector<10x32xf32>
    %9 = arith.truncf %8 : vector<10x32xf32> to vector<10x32xbf16>
    %c0_7 = arith.constant 0 : index
    %c0_8 = arith.constant 0 : index
    %10 = vector.load %arg6[%c0_7, %c0_8] : memref<10x32xbf16, #tpu.memory_space<vmem>>, vector<10x32xbf16>
    tpu.vector_store %arg6[%c0_7, %c0_8], %9 {strides = array<i32>} : memref<10x32xbf16, #tpu.memory_space<vmem>>, vector<10x32xbf16>,
    return
  }
  func.func @transform_0(%arg0: i32, %arg1: i32) -> (i32, i32) {
    %c0_i32 = arith.constant 0 : i32
    %c0_i32_0 = arith.constant 0 : i32
    return %arg0, %c0_i32 : i32, i32
  }
  func.func @transform_1(%arg0: i32, %arg1: i32) -> (i32, i32) {
    %c0_i32 = arith.constant 0 : i32
    %c0_i32_0 = arith.constant 0 : i32
    return %c0_i32, %arg1 : i32, i32
  }
  func.func @transform_2(%arg0: i32, %arg1: i32) -> (i32, i32) {
    %c0_i32 = arith.constant 0 : i32
    %c0_i32_0 = arith.constant 0 : i32
    return %c0_i32, %arg1 : i32, i32
  }
  func.func @transform_3(%arg0: i32, %arg1: i32) -> (i32, i32) {
    %c0_i32 = arith.constant 0 : i32
    return %arg0, %arg1 : i32, i32
  }
  func.func @transform_4(%arg0: i32, %arg1: i32) -> (i32, i32) {
    %c0_i32 = arith.constant 0 : i32
    return %arg0, %arg1 : i32, i32
  }
}

module attributes {stable_mosaic.version = 11 : i64} {
  func.func @kernel(%arg0: i32, %arg1: i32, %arg2: memref<2x32xbf16, #tpu.memory_space<vmem>>, %arg3: memref<1x32xf32, #tpu.memory_space<vmem>>, %arg4: memref<1x32xf32, #tpu.memory_space<vmem>>, %arg5: memref<32x16xbf16, #tpu.memory_space<vmem>>, %arg6: memref<1x16xf32, #tpu.memory_space<vmem>>, %arg7: memref<2x16xf32, #tpu.memory_space<vmem>>, %arg8: memref<2x32xbf16, #tpu.memory_space<vmem>>) attributes {dimension_semantics = [#tpu.dimension_semantics<parallel>, #tpu.dimension_semantics<arbitrary>], iteration_bounds = array<i64: 1, 1>, scalar_prefetch = 0 : i64, scratch_operands = 1 : i64, tpu.core_type = #tpu.core_type<tc>, window_params = [{transform_indices = @transform_0, window_bounds = array<i64: 2, 32>}, {pipeline_mode = #tpu.pipeline_mode<synchronous>, transform_indices = @transform_1, window_bounds = array<i64: 1, 32>}, {pipeline_mode = #tpu.pipeline_mode<synchronous>, transform_indices = @transform_2, window_bounds = array<i64: 1, 32>}, {transform_indices = @transform_3, window_bounds = array<i64: 32, 16>}, {transform_indices = @transform_4, window_bounds = array<i64: 1, 16>}, {transform_indices = @transform_5, window_bounds = array<i64: 2, 16>}]} {
    %c0_i32 = arith.constant 0 : i32
    %0 = arith.cmpi eq, %arg1, %c0_i32 : i32
    %1 = arith.extui %0 : i1 to i32
    %c0_i32_0 = arith.constant 0 : i32
    %2 = arith.cmpi ne, %1, %c0_i32_0 : i32
    scf.if %2 {
      %c0_8 = arith.constant 0 : index
      %c0_9 = arith.constant 0 : index
      %10 = vector.load %arg2[%c0_8, %c0_9] : memref<2x32xbf16, #tpu.memory_space<vmem>>, vector<2x32xbf16>
      %11 = arith.extf %10 : vector<2x32xbf16> to vector<2x32xf32>
      %cst_10 = arith.constant dense<0.000000e+00> : vector<2xf32>
      %12 = vector.multi_reduction <add>, %11, %cst_10 [1] : vector<2x32xf32> to vector<2xf32>
      %13 = vector.shape_cast %12 : vector<2xf32> to vector<2x1xf32>
      %cst_11 = arith.constant 3.200000e+01 : f32
      %14 = vector.broadcast %cst_11 : f32 to vector<2x1xf32>
      %15 = arith.divf %13, %14 : vector<2x1xf32>
      %16 = vector.broadcast %15 : vector<2x1xf32> to vector<2x32xf32>
      %17 = arith.subf %11, %16 : vector<2x32xf32>
      %18 = vector.broadcast %15 : vector<2x1xf32> to vector<2x32xf32>
      %19 = arith.subf %11, %18 : vector<2x32xf32>
      %20 = arith.mulf %17, %19 : vector<2x32xf32>
      %cst_12 = arith.constant dense<0.000000e+00> : vector<2xf32>
      %21 = vector.multi_reduction <add>, %20, %cst_12 [1] : vector<2x32xf32> to vector<2xf32>
      %22 = vector.shape_cast %21 : vector<2xf32> to vector<2x1xf32>
      %cst_13 = arith.constant 3.200000e+01 : f32
      %23 = vector.broadcast %cst_13 : f32 to vector<2x1xf32>
      %24 = arith.divf %22, %23 : vector<2x1xf32>
      %25 = vector.broadcast %15 : vector<2x1xf32> to vector<2x32xf32>
      %26 = arith.subf %11, %25 : vector<2x32xf32>
      %cst_14 = arith.constant 9.99999974E-6 : f32
      %27 = vector.broadcast %cst_14 : f32 to vector<2x1xf32>
      %28 = arith.addf %24, %27 : vector<2x1xf32>
      %29 = math.rsqrt %28 : vector<2x1xf32>
      %30 = vector.broadcast %29 : vector<2x1xf32> to vector<2x32xf32>
      %31 = arith.mulf %26, %30 : vector<2x32xf32>
      %c0_15 = arith.constant 0 : index
      %c0_16 = arith.constant 0 : index
      %32 = vector.load %arg3[%c0_15, %c0_16] : memref<1x32xf32, #tpu.memory_space<vmem>>, vector<1x32xf32>
      %33 = vector.broadcast %32 : vector<1x32xf32> to vector<2x32xf32>
      %34 = arith.mulf %31, %33 : vector<2x32xf32>
      %c0_17 = arith.constant 0 : index
      %c0_18 = arith.constant 0 : index
      %35 = vector.load %arg4[%c0_17, %c0_18] : memref<1x32xf32, #tpu.memory_space<vmem>>, vector<1x32xf32>
      %36 = vector.broadcast %35 : vector<1x32xf32> to vector<2x32xf32>
      %37 = arith.addf %34, %36 : vector<2x32xf32>
      %38 = arith.truncf %37 : vector<2x32xf32> to vector<2x32xbf16>
      %c0_19 = arith.constant 0 : index
      %c0_20 = arith.constant 0 : index
      %39 = vector.load %arg8[%c0_19, %c0_20] : memref<2x32xbf16, #tpu.memory_space<vmem>>, vector<2x32xbf16>
      tpu.vector_store %arg8[%c0_19, %c0_20], %38 {strides = array<i32>} : memref<2x32xbf16, #tpu.memory_space<vmem>>, vector<2x32xbf16>,
    } else {
    }
    %c0 = arith.constant 0 : index
    %c0_1 = arith.constant 0 : index
    %3 = vector.load %arg8[%c0, %c0_1] : memref<2x32xbf16, #tpu.memory_space<vmem>>, vector<2x32xbf16>
    %c0_2 = arith.constant 0 : index
    %c0_3 = arith.constant 0 : index
    %4 = vector.load %arg5[%c0_2, %c0_3] : memref<32x16xbf16, #tpu.memory_space<vmem>>, vector<32x16xbf16>
    %cst = arith.constant dense<0.000000e+00> : vector<2x16xf32>
    %5 = tpu.matmul %3, %4, %cst {dimension_numbers = #tpu.dot_dimension_numbers<[1], [0], [0], [1], [0, 0, 1, 1], [], []>} : vector<2x32xbf16>, vector<32x16xbf16>, vector<2x16xf32> -> vector<2x16xf32>
    %c0_4 = arith.constant 0 : index
    %c0_5 = arith.constant 0 : index
    %6 = vector.load %arg6[%c0_4, %c0_5] : memref<1x16xf32, #tpu.memory_space<vmem>>, vector<1x16xf32>
    %7 = vector.broadcast %6 : vector<1x16xf32> to vector<2x16xf32>
    %8 = arith.addf %5, %7 : vector<2x16xf32>
    %c0_6 = arith.constant 0 : index
    %c0_7 = arith.constant 0 : index
    %9 = vector.load %arg7[%c0_6, %c0_7] : memref<2x16xf32, #tpu.memory_space<vmem>>, vector<2x16xf32>
    tpu.vector_store %arg7[%c0_6, %c0_7], %8 {strides = array<i32>} : memref<2x16xf32, #tpu.memory_space<vmem>>, vector<2x16xf32>,
    return
  }
  func.func @transform_0(%arg0: i32, %arg1: i32) -> (i32, i32) {
    %c0_i32 = arith.constant 0 : i32
    %c0_i32_0 = arith.constant 0 : i32
    return %arg0, %c0_i32 : i32, i32
  }
  func.func @transform_1(%arg0: i32, %arg1: i32) -> (i32, i32) {
    %c0_i32 = arith.constant 0 : i32
    %c0_i32_0 = arith.constant 0 : i32
    %c0_i32_1 = arith.constant 0 : i32
    return %c0_i32, %c0_i32_0 : i32, i32
  }
  func.func @transform_2(%arg0: i32, %arg1: i32) -> (i32, i32) {
    %c0_i32 = arith.constant 0 : i32
    %c0_i32_0 = arith.constant 0 : i32
    %c0_i32_1 = arith.constant 0 : i32
    return %c0_i32, %c0_i32_0 : i32, i32
  }
  func.func @transform_3(%arg0: i32, %arg1: i32) -> (i32, i32) {
    %c0_i32 = arith.constant 0 : i32
    %c0_i32_0 = arith.constant 0 : i32
    return %c0_i32, %arg1 : i32, i32
  }
  func.func @transform_4(%arg0: i32, %arg1: i32) -> (i32, i32) {
    %c0_i32 = arith.constant 0 : i32
    %c0_i32_0 = arith.constant 0 : i32
    return %c0_i32, %arg1 : i32, i32
  }
  func.func @transform_5(%arg0: i32, %arg1: i32) -> (i32, i32) {
    %c0_i32 = arith.constant 0 : i32
    return %arg0, %arg1 : i32, i32
  }
}

</mosaic_0001>

<bundles_post_ra>
// kernel: encode_image.15
= control target key start
LH: loop header
LB: loop body
LE: loop exit
PB: predicated region body
PF: predicated region fallthrough
CT: control target
= control target key end

     0   :  { %vm29_vm0 = vcmask 261120   ;;  %vm33_vm1 = vcmask 254976   ;;  %v214_v17 = vmov 0.0   ;;  %vm215_vm2 = vmmov 0   ;;  %s276_s0 = inlined_call_operand.vmem [shape: bf16[10,32], index: 0, kind: input, shape index: {}]   ;;  %s277_s3 = inlined_call_operand.vmem [shape: bf16[32,96], index: 3, kind: input, shape index: {}]   ;;  %s278_s1 = inlined_call_operand.vmem [shape: f32[1,32], index: 1, kind: input, shape index: {}]   ;;  %s279_s2 = inlined_call_operand.vmem [shape: f32[1,32], index: 2, kind: input, shape index: {}]   ;;  %s280_s4 = inlined_call_operand.vmem [shape: f32[1,96], index: 4, kind: input, shape index: {}]   ;;  %s281_s5 = inlined_call_operand.vmem [shape: bf16[10,96], index: 5, kind: output, shape index: {}]  }
   0x1   :  { %v25_v0 = vld [vmem:[%s276_s0] sm:$0xf]  ;;  %v26_v1 = vld [vmem:[%s276_s0 + $0x4] sm:$0x1]  ;;  %197 = vmatprep.subr.bf16.mxu0 %v214_v17  ;;  %v208_v18 = vld [vmem:[%s277_s3 + $0x8] sm:$0xff]   ;;  %201 = vmatprep.mubr.msk.bf16.mxu0 %vm215_vm2, %v214_v17  ;;  %vm84_vm3 = vcmask 257024  }
   0x2   :  { %v27_v2 = vunpack.c.l.bf16 %v25_v0  ;;  %v28_v3 = vunpack.c.l.bf16 %v26_v1  ;;  %v207_v16 = vld [vmem:[%s277_s3] sm:$0xff]   ;;  %vm86_vm4 = vcmask 253952   ;;  %vm171_vm5 = vcmask 781312  }
   0x3   :  { %198 = vmatpush3.bf16.msra.mxu0 %v207_v16  ;;  %v179_v26 = vld [vmem:[%s278_s1] ss:$0 sm:$0xff]  ;;  %vm173_vm6 = vcmask 778240  }
   0x4   :  { %v30_v4 = vsel %vm29_vm0, %v27_v2, 0.0  ;;  %v34_v5 = vsel %vm33_vm1, %v28_v3, 0.0  ;;  %199 = vmatprep.subr.bf16.mxu0 %v214_v17  ;;  %v180_v28 = vld [vmem:[%s279_s2] ss:$0 sm:$0xff] }
   0x5   :  { %31 = vadd.xlane.f32.xlu0 %v30_v4  ;;  %v183_v38 = vld [vmem:[%s280_s4] ss:$0 sm:$0xff] }
   0x7   :  { %200 = vmatpush3.bf16.msra.mxu0 %v208_v18 }
   0x9   :  { %35 = vadd.xlane.f32.xlu0 %v34_v5 }
  0x92   :  { %v32_v6 = vpop.xlane.xlu0 %31 }
  0x93   :  { %v38_v7 = vmul.f32 0.03125, %v32_v6 }
  0x95   :  { %v40_v8 = vsub.f32 %v27_v2, %v38_v7 }
  0x96   :  { %v36_v9 = vpop.xlane.xlu0 %35 }
  0x97   :  { %v39_v10 = vmul.f32 0.03125, %v36_v9  ;;  %v42_v11 = vmul.f32 %v40_v8, %v40_v8 }
  0x99   :  { %v41_v12 = vsub.f32 %v28_v3, %v39_v10  ;;  %v44_v13 = vsel %vm29_vm0, %v42_v11, 0.0 }
  0x9a   :  { %45 = vadd.xlane.f32.xlu1 %v44_v13 }
  0x9b   :  { %v43_v14 = vmul.f32 %v41_v12, %v41_v12 }
  0x9d   :  { %v47_v15 = vsel %vm33_vm1, %v43_v14, 0.0 }
  0x9e   :  { %48 = vadd.xlane.f32.xlu1 %v47_v15 }
 0x127   :  { %v46_v19 = vpop.xlane.xlu1 %45 }
 0x128   :  { %v50_v20 = vmul.f32 0.03125, %v46_v19 }
 0x12a   :  { %v52_v21 = vadd.f32 1e-05, %v50_v20 }
 0x12b   :  { %v49_v22 = vpop.xlane.xlu1 %48 }
 0x12c   :  { %210 = vrsqrt.f32 %v52_v21  ;;  %v51_v23 = vmul.f32 0.03125, %v49_v22 }
 0x12e   :  { %v53_v24 = vadd.f32 1e-05, %v51_v23 }
 0x130   :  { %212 = vrsqrt.f32 %v53_v24 }
 0x136   :  { %v211_v25 = vpop.eup %210 }
 0x137   :  { %v56_v27 = vmul.f32 %v211_v25, %v40_v8 }
 0x139   :  { %v65_v29 = vmul.f32 %v179_v26, %v56_v27 }
 0x13a   :  { %v213_v30 = vpop.eup %212 }
 0x13b   :  { %v74_v31 = vadd.f32 %v180_v28, %v65_v29  ;;  %v57_v32 = vmul.f32 %v213_v30, %v41_v12 }
 0x13d   :  { %v190_v33 = vpack.c.bf16 %v74_v31, %v74_v31  ;;  %v66_v34 = vmul.f32 %v179_v26, %v57_v32 }
 0x13f   :  { %85 = vst.msk [vmem:[#allocation2] sm:$0xf] %vm84_vm3, %v190_v33  ;;  %v75_v35 = vadd.f32 %v180_v28, %v66_v34 }
 0x141   :  { %v191_v36 = vpack.c.bf16 %v75_v35, %v75_v35 }
 0x143   :  { %87 = vst.msk [vmem:[#allocation2 + $0x4] sm:$0x1] %vm86_vm4, %v191_v36 }
 0x14a   :  { %v209_v37 = vld [vmem:[#allocation2] sm:$0x1f]  }
 0x14b   :  { %202 = vmatmul.mubr.msk.bf16.vlgmr.msra.gmra.mrb[0].mxu0 %vm29_vm0, %v209_v37 }
 0x21e   :  { %v156_v39 = vpop.f32.mrb[0].mxu0 }
 0x21f   :  { %v157_v40 = vadd.f32 %v183_v38, %v156_v39  ;;  %v203_v41 = vpop.f32.mrb[1].mxu0 }
 0x220   :  { %v159_v42 = vpop.f32.mrb[2].mxu0 }
 0x221   :  { %v192_v43 = vpack.c.bf16 %v157_v40, %v157_v40  ;;  %v160_v44 = vadd.f32 %v183_v38, %v159_v42  ;;  %v204_v45 = vpop.f32.mrb[3].mxu0 }
 0x223   :  { %172 = vst.msk [vmem:[%s281_s5] sm:$0xf] %vm171_vm5, %v192_v43  ;;  %v193_v46 = vpack.c.bf16 %v160_v44, %v160_v44 }
 0x225   :  { %174 = vst.msk [vmem:[%s281_s5 + $0x4] sm:$0x1] %vm173_vm6, %v193_v46 }

// kernel: encode_image.13
= control target key start
LH: loop header
LB: loop body
LE: loop exit
PB: predicated region body
PF: predicated region fallthrough
CT: control target
= control target key end

     0   :  { %v207_v0 = vmov 0   ;;  %vm125_vm0 = vcmask 523264   ;;  %vm170_vm1 = vcmask 257024   ;;  %s273_s1 = inlined_call_operand.vmem [shape: bf16[192,32], index: 1, kind: input, shape index: {}]   ;;  %s274_s0 = inlined_call_operand.vmem [shape: bf16[8,192], index: 0, kind: input, shape index: {}]   ;;  %s275_s2 = inlined_call_operand.vmem [shape: f32[1,32], index: 2, kind: input, shape index: {}]   ;;  %s276_s3 = inlined_call_operand.vmem [shape: bf16[8,32], index: 3, kind: output, shape index: {}]  }
   0x1   :  { %129 = vmatprep.subr.bf16.mxu0 %v207_v0  ;;  %v193_v1 = vld [vmem:[%s273_s1] sm:$0xff]   ;;  %v194_v2 = vld [vmem:[%s273_s1 + $0x8] sm:$0xff]   ;;  %v195_v3 = vld [vmem:[%s273_s1 + $0x10] sm:$0xff]  }
   0x2   :  { %130 = vmatpush1.bf16.msra.mxu0 %v193_v1  ;;  %v196_v4 = vld [vmem:[%s273_s1 + $0x18] sm:$0xff]   ;;  %v15_v5 = vld [vmem:[%s274_s0] sm:$0xff]  ;;  %v198_v8 = vld [vmem:[%s273_s1 + $0x28] sm:$0xff]  }
   0x3   :  { %131 = vmatprep.subr.bf16.mxu0 %v207_v0  ;;  %v178_v6 = vcombine.high %v15_v5, %v15_v5  ;;  %v197_v7 = vld [vmem:[%s273_s1 + $0x20] sm:$0xff]   ;;  %v199_v9 = vld [vmem:[%s273_s1 + $0x30] sm:$0xff]   ;;  %v200_v10 = vld [vmem:[%s273_s1 + $0x38] sm:$0xff]   ;;  %v177_v15 = vcombine.low %v15_v5, %v15_v5 }
   0x4   :  { %v201_v11 = vld [vmem:[%s273_s1 + $0x40] sm:$0xff]   ;;  %v202_v12 = vld [vmem:[%s273_s1 + $0x48] sm:$0xff]   ;;  %v203_v13 = vld [vmem:[%s273_s1 + $0x50] sm:$0xff]  }
   0x5   :  { %191 = vmatprep.mubr.msk.bf16.mxu0 %vm125_vm0, %v178_v6  ;;  %v204_v14 = vld [vmem:[%s273_s1 + $0x58] sm:$0xff]   ;;  %v176_v16 = vld [vmem:[%s275_s2] ss:$0 sm:$0xff] }
   0x6   :  { %132 = vmatpush1.bf16.msra.mxu0 %v194_v2 }
   0x7   :  { %133 = vmatprep.subr.bf16.mxu0 %v207_v0 }
   0xa   :  { %134 = vmatpush1.bf16.msra.mxu0 %v195_v3 }
   0xb   :  { %135 = vmatprep.subr.bf16.mxu0 %v207_v0 }
   0xe   :  { %136 = vmatpush1.bf16.msra.mxu0 %v196_v4 }
   0xf   :  { %137 = vmatprep.subr.bf16.mxu0 %v207_v0 }
  0x12   :  { %138 = vmatpush1.bf16.msra.mxu0 %v197_v7 }
  0x13   :  { %139 = vmatprep.subr.bf16.mxu0 %v207_v0 }
  0x16   :  { %140 = vmatpush1.bf16.msra.mxu0 %v198_v8 }
  0x17   :  { %141 = vmatprep.subr.bf16.mxu0 %v207_v0 }
  0x1a   :  { %142 = vmatpush1.bf16.msra.mxu0 %v199_v9 }
  0x1b   :  { %143 = vmatprep.subr.bf16.mxu0 %v207_v0 }
  0x1e   :  { %144 = vmatpush1.bf16.msra.mxu0 %v200_v10 }
  0x1f   :  { %145 = vmatprep.subr.bf16.mxu0 %v207_v0 }
  0x22   :  { %146 = vmatpush1.bf16.msra.mxu0 %v201_v11 }
  0x23   :  { %147 = vmatprep.subr.bf16.mxu0 %v207_v0 }
  0x26   :  { %148 = vmatpush1.bf16.msra.mxu0 %v202_v12 }
  0x27   :  { %149 = vmatprep.subr.bf16.mxu0 %v207_v0 }
  0x2a   :  { %150 = vmatpush1.bf16.msra.mxu0 %v203_v13 }
  0x2b   :  { %151 = vmatprep.subr.bf16.mxu0 %v207_v0 }
  0x2e   :  { %152 = vmatpush1.bf16.msra.mxu0 %v204_v14 }
  0x31   :  { %162 = vmatmul.mubr.bf16.vlgmr.msra.gmra.mrb[0].mxu0 %v177_v15 }
 0x104   :  { %v163_v17 = vpop.f32.mrb[0].mxu0 }
 0x105   :  { %v164_v18 = vadd.f32 %v176_v16, %v163_v17  ;;  %v165_v19 = vpop.f32.mrb[1].mxu0 }
 0x106   :  { %v166_v20 = vpop.f32.mrb[2].mxu0 }
 0x107   :  { %v169_v21 = vpack.c.bf16 %v164_v18, %v164_v18  ;;  %v167_v22 = vpop.f32.mrb[3].mxu0 }
 0x109   :  { %171 = vst.msk [vmem:[%s276_s3] sm:$0xf] %vm170_vm1, %v169_v21 }

// kernel: encode_image.14
= control target key start
LH: loop header
LB: loop body
LE: loop exit
PB: predicated region body
PF: predicated region fallthrough
CT: control target
= control target key end

     0   :  { %s380_s18 = smov 0   ;;  %s413_s0 = inlined_call_operand.vmem [shape: bf16[2,4,32], index: 0, kind: input, shape index: {}]   ;;  %s414_s1 = inlined_call_operand.vmem [shape: f32[1,32], index: 1, kind: input, shape index: {}]   ;;  %s415_s2 = inlined_call_operand.vmem [shape: f32[5,32], index: 2, kind: input, shape index: {}]   ;;  %s416_s3 = inlined_call_operand.vmem [shape: f32[1,32], index: 3, kind: input, shape index: {}]   ;;  %s417_s4 = inlined_call_operand.vmem [shape: f32[1,32], index: 4, kind: input, shape index: {}]   ;;  %s418_s5 = inlined_call_operand.vmem [shape: bf16[2,5,32], index: 5, kind: output, shape index: {}]  }
   0x1 LB: > { %s321_s19 = sadd.s32 4294967295, %s348_s18   ;;  %p325_p0 = scmp.ge.s32.totalorder %s348_s18, 1  ;;  %s348_s18 = sphi %s380_s18, %s15_s18  }
   0x2   : > { %p186_p1 = scmp.lt.s32.totalorder %s348_s18, 3 }
   0x4   : > { %p187_p2 = pnand %p325_p0, %p186_p1 }
   0x5   : > { %p212_p3 = scmp.lt.s32.totalorder (!%p187_p2), %s321_s19, 1  ;;  %v222_v2 = vld [vmem:[%s414_s1] sm:$0x1] (!%p187_p2)  ;;  %vm226_vm0 = vcmask (!%p187_p2), 1040384   ;;  %vm230_vm1 = vcmask (!%p187_p2), 258048   ;;  %vm262_vm2 = vcmask (!%p187_p2), 256000  }
   0x6   : > { %190 = sbr.rel (%p187_p2) target bundleno = 341 (0x155), region = 40  ;;  %v228_v4 = vld [vmem:[%s415_s2] sm:$0x1f] (!%p187_p2)  ;;  %vm263_vm3 = vsmask.f32 (!%p187_p2), 2304 }
   0x7   : > { %v328_v17 = vld [vmem:[%s416_s3] ss:$0 sm:$0xff] (!%p187_p2)  ;;  %vm264_vm4 = vmand (!%p187_p2), %vm262_vm2, %vm263_vm3 }
   0x8   : > { %v329_v19 = vld [vmem:[%s417_s4] ss:$0 sm:$0xff] (!%p187_p2) }
   0xd   : > { %s420_s19 = smov (!%p212_p3, %s321_s19), 1 }
   0xe   : > { %s326_s20 = sshll.u32 %s420_s19, 1  ;;  %s327_s28 = sshll.u32 %s420_s19, 2 }
   0xf   : > { %s215_s23 = scalar_lea.vmem %s413_s0, %s326_s20  ;;  %s219_s10 = scalar_lea.vmem %s418_s5, %s327_s28 }
  0x10   : > { %v220_v0 = vld [vmem:[%s215_s23] sm:$0x3] }
  0x11   : > { %v221_v1 = vunpack.c.l.bf16 %v220_v0  ;;  %v265_v22 = vld [vmem:[%s219_s10] sm:$0x7] }
  0x13   : > { %v224_v3 = vrot.slane %v221_v1, 7 }
  0x15   : > { %v227_v5 = vsel %vm226_vm0, %v222_v2, %v224_v3 }
  0x16   : > { %v229_v6 = vadd.f32 %v228_v4, %v227_v5 }
  0x18   : > { %v231_v7 = vsel %vm230_vm1, %v229_v6, 0.0 }
  0x19   : > { %232 = vadd.xlane.f32.xlu0 %v231_v7 }
  0xa6   : > { %v233_v8 = vpop.xlane.xlu0 %232 }
  0xa7   : > { %v235_v9 = vmul.f32 0.03125, %v233_v8 }
  0xa9   : > { %v236_v10 = vsub.f32 %v229_v6, %v235_v9 }
  0xab   : > { %v237_v11 = vmul.f32 %v236_v10, %v236_v10 }
  0xad   : > { %v238_v12 = vsel %vm230_vm1, %v237_v11, 0.0 }
  0xae   : > { %239 = vadd.xlane.f32.xlu0 %v238_v12 }
 0x13b   : > { %v240_v13 = vpop.xlane.xlu0 %239 }
 0x13c   : > { %v241_v14 = vmul.f32 0.03125, %v240_v13 }
 0x13e   : > { %v242_v15 = vadd.f32 1e-05, %v241_v14 }
 0x140   : > { %340 = vrsqrt.f32 %v242_v15 }
 0x14a   : > { %v341_v16 = vpop.eup %340 }
 0x14b   : > { %v244_v18 = vmul.f32 %v341_v16, %v236_v10 }
 0x14d   : > { %v252_v20 = vmul.f32 %v328_v17, %v244_v18 }
 0x14f   : > { %v260_v21 = vadd.f32 %v329_v19, %v252_v20 }
 0x151   : > { %v261_v23 = vpack.c.bf16 %v260_v21, %v260_v21 }
 0x153   : > { %v266_v24 = vsel %vm264_vm4, %v261_v23, %v265_v22 }
 0x154   : > { %267 = vst [vmem:[%s219_s10] sm:$0x7] %v266_v24 }
 0x155 PF: > { %s15_s18 = sadd.s32 1, %s348_s18  }
 0x156   : > { %p12_p4 = scmp.ge.s32.totalorder %s15_s18, 4  }
 0x158   :  { %14 = sbr.rel (!%p12_p4) target bundleno = 1 (0x1), region = 70 }

// kernel: encode_image.16
= control target key start
LH: loop header
LB: loop body
LE: loop exit
PB: predicated region body
PF: predicated region fallthrough
CT: control target
= control target key end

     0   :  { %s795_s6 = smov 0   ;;  %s880_s0 = inlined_call_operand.vmem [shape: bf16[2,5,96], index: 0, kind: input, shape index: {}]   ;;  %s881_s1 = inlined_call_operand.vmem [shape: bf16[2,5,32], index: 1, kind: output, shape index: {}]  }
   0x1 LB: > { %s645_s7 = sadd.s32 4294967295, %s772_s6   ;;  %p649_p0 = scmp.ge.s32.totalorder %s772_s6, 1  ;;  %s772_s6 = sphi %s795_s6, %s11_s6  }
   0x2   : > { %p86_p1 = scmp.lt.s32.totalorder %s772_s6, 3 }
   0x4   : > { %p87_p2 = pnand %p649_p0, %p86_p1 }
   0x5   : > { %p104_p3 = scmp.lt.s32.totalorder (!%p87_p2), %s645_s7, 1  ;;  %v774_v0 = vmov (!%p87_p2), 0.0   ;;  %vm775_vm0 = vmmov (!%p87_p2), 0   ;;  %s776_s12 = smov (!%p87_p2), 104   ;;  %vm125_vm1 = vcmask (!%p87_p2), 64512   ;;  %vm322_vm2 = vcmask (!%p87_p2), 36864  }
   0x6   : > { %90 = sbr.rel (%p87_p2) target bundleno = 1125 (0x465), region = 24  ;;  %682 = vmatprep.subr.bf16.mxu0 (!%p87_p2), %v774_v0  ;;  %684 = vmatprep.mubr.msk.bf16.mxu0 (!%p87_p2), %vm775_vm0, %v774_v0  ;;  %s777_s13 = smov (!%p87_p2), 120   ;;  %vm377_vm3 = vcmask (!%p87_p2), 1041408   ;;  %vm378_vm4 = vcmask (!%p87_p2), 1042432   ;;  %v781_v47 = vmov (!%p87_p2), 65535   ;;  %vm373_vm5 = vcmask (!%p87_p2), 39936  }
   0x7   : > { %688 = vmatprep.subr.bf16.mxu1 (!%p87_p2), %v774_v0  ;;  %690 = vmatprep.mubr.msk.bf16.mxu1 (!%p87_p2), %vm775_vm0, %v774_v0  ;;  %s778_s14 = smov (!%p87_p2), 112   ;;  %s779_s15 = smov (!%p87_p2), 96   ;;  %v379_v48 = vsel (!%p87_p2), %vm377_vm3, 4294967295, %v781_v47  ;;  %vm581_vm6 = vcmask (!%p87_p2), 130048   ;;  %vm583_vm7 = vcmask (!%p87_p2), 195584   ;;  %vm586_vm8 = vcmask (!%p87_p2), 256000  }
   0x8   : > { %s780_s16 = smov (!%p87_p2), 64   ;;  %v380_v51 = vsel (!%p87_p2), %vm378_vm4, %v379_v48, 0  ;;  %s782_s17 = smov (!%p87_p2), 8   ;;  %vm587_vm9 = vsmask.f32 (!%p87_p2), 2304 }
   0x9   : > { %s783_s18 = smov (!%p87_p2), 16   ;;  %s784_s19 = smov (!%p87_p2), 24   ;;  %vm588_vm10 = vmand (!%p87_p2), %vm586_vm8, %vm587_vm9 }
   0xd   : > { %s883_s7 = smov (!%p104_p3, %s645_s7), 1 }
   0xe   : > { %s650_s8 = sshll.u32 %s883_s7, 2 }
   0xf   : > { %s107_s11 = scalar_lea.vmem %s880_s0, %s650_s8  ;;  %s111_s22 = scalar_lea.vmem %s881_s1, %s650_s8 }
  0x10   : > { %v113_v1 = vld [vmem:[%s107_s11] sm:$0x7] }
  0x11   : > { %119 = vrot.lane.b32.xlu1 %v113_v1, %s776_s12  ;;  %115 = vrot.lane.b32.xlu0 %v113_v1, %s777_s13  ;;  %v817_v2 = vcombine.low %v113_v1, %v113_v1 }
  0x15   : > { %117 = vrot.lane.b32.xlu0 %v113_v1, %s778_s14  ;;  %123 = vrot.lane.b32.xlu1 %v817_v2, %s779_s15 }
  0x83   : > { %v120_v3 = vpop.permute.xlu1 %119  ;;  %v116_v4 = vpop.permute.xlu0 %115 }
  0x84   : > { %v654_v5 = vcombine.low %v116_v4, %v116_v4  ;;  %v820_v6 = vcombine.low %v120_v3, %v120_v3 }
  0x86   : > { %174 = vrot.lane.b32.xlu0 %v654_v5, %s779_s15 }
  0x87   : > { %v118_v7 = vpop.permute.xlu0 %117  ;;  %v124_v8 = vpop.permute.xlu1 %123 }
  0x88   : > { %v822_v9 = vcombine.low %v118_v7, %v118_v7  ;;  %v130_v10 = vsel %vm125_vm1, %v124_v8, 0 }
  0x89   : > { %683 = vmatpush3.bf16.xpose.msra.mxu0 %v130_v10 }
  0x8a   : > { %224 = vrot.lane.b32.xlu1 %v822_v9, %s779_s15  ;;  %274 = vrot.lane.b32.xlu0 %v820_v6, %s779_s15 }
  0x8b   : > { %694 = vmatprep.subr.bf16.mxu0 %v774_v0 }
  0x90   : > { %685 = vmatmul.mubr.msk.bf16.vlgmr.msra.gmra.mrb[0].mxu0 %vm125_vm1, %v113_v1 }
  0x91   : > { %696 = vmatprep.mubr.msk.bf16.mxu0 %vm775_vm0, %v774_v0 }
  0xf8   : > { %v175_v11 = vpop.permute.xlu0 %174 }
  0xf9   : > { %v180_v12 = vsel %vm125_vm1, %v175_v11, 0 }
  0xfa   : > { %689 = vmatpush3.bf16.xpose.msra.mxu1 %v180_v12 }
  0xfb   : > { %700 = vmatprep.subr.bf16.mxu1 %v774_v0 }
  0xfc   : > { %v225_v13 = vpop.permute.xlu1 %224  ;;  %v275_v14 = vpop.permute.xlu0 %274 }
  0xfd   : > { %v230_v15 = vsel %vm125_vm1, %v225_v13, 0  ;;  %v280_v16 = vsel %vm125_vm1, %v275_v14, 0 }
  0xfe   : > { %695 = vmatpush3.bf16.xpose.msra.mxu0 %v230_v15 }
  0xff   : > { %706 = vmatprep.subr.bf16.mxu0 %v774_v0 }
 0x101   : > { %691 = vmatmul.mubr.msk.bf16.vlgmr.msra.gmra.mrb[0].mxu1 %vm125_vm1, %v116_v4 }
 0x102   : > { %701 = vmatpush3.bf16.xpose.msra.mxu1 %v280_v16  ;;  %702 = vmatprep.mubr.msk.bf16.mxu1 %vm775_vm0, %v774_v0 }
 0x103   : > { %712 = vmatprep.subr.bf16.mxu1 %v774_v0 }
 0x105   : > { %697 = vmatmul.mubr.msk.bf16.vlgmr.msra.gmra.mrb[4].mxu0 %vm125_vm1, %v118_v7 }
 0x106   : > { %708 = vmatprep.mubr.msk.bf16.mxu0 %vm775_vm0, %v774_v0 }
 0x109   : > { %703 = vmatmul.mubr.msk.bf16.vlgmr.msra.gmra.mrb[4].mxu1 %vm125_vm1, %v120_v3 }
 0x10a   : > { %714 = vmatprep.mubr.msk.bf16.mxu1 %vm775_vm0, %v774_v0 }
 0x163   : > { %v166_v17 = vpop.f32.mrb[0].mxu0 }
 0x164   : > { %v323_v18 = vsel %vm322_vm2, %v166_v17, -inf  ;;  %v686_v19 = vpop.f32.mrb[1].mxu0 }
 0x165   : > { %324 = vmax.xlane.f32.xlu1 %v323_v18  ;;  %v169_v20 = vpop.f32.mrb[2].mxu0 }
 0x166   : > { %v687_v21 = vpop.f32.mrb[3].mxu0 }
 0x1d4   : > { %v216_v22 = vpop.f32.mrb[0].mxu1 }
 0x1d5   : > { %v692_v23 = vpop.f32.mrb[1].mxu1  ;;  %v326_v24 = vsel %vm322_vm2, %v216_v22, -inf }
 0x1d6   : > { %327 = vmax.xlane.f32.xlu0 %v326_v24  ;;  %v219_v25 = vpop.f32.mrb[2].mxu1 }
 0x1d7   : > { %v693_v26 = vpop.f32.mrb[3].mxu1 }
 0x1d8   : > { %v266_v27 = vpop.f32.mrb[4].mxu0 }
 0x1d9   : > { %v698_v28 = vpop.f32.mrb[5].mxu0  ;;  %v329_v29 = vsel %vm322_vm2, %v266_v27, -inf }
 0x1da   : > { %330 = vmax.xlane.f32.xlu0 %v329_v29  ;;  %v269_v30 = vpop.f32.mrb[6].mxu0 }
 0x1db   : > { %v699_v31 = vpop.f32.mrb[7].mxu0 }
 0x1dc   : > { %v316_v32 = vpop.f32.mrb[4].mxu1 }
 0x1dd   : > { %v704_v33 = vpop.f32.mrb[5].mxu1  ;;  %v332_v34 = vsel %vm322_vm2, %v316_v32, -inf }
 0x1de   : > { %v319_v35 = vpop.f32.mrb[6].mxu1  ;;  %333 = vmax.xlane.f32.xlu1 %v332_v34 }
 0x1df   : > { %v705_v36 = vpop.f32.mrb[7].mxu1 }
 0x1ef   : > { %424 = vrot.lane.b32.xlu1 %v654_v5, %s780_s16 }
 0x1f0   : > { %371 = vrot.lane.b32.xlu0 %v817_v2, %s780_s16 }
 0x1f2   : > { %v325_v37 = vpop.xlane.xlu1 %324 }
 0x1f3   : > { %v335_v38 = vsub.f32 %v166_v17, %v325_v37 }
 0x1f5   : > { %v339_v39 = vmul.f32 1.442695, %v335_v38 }
 0x1f7   : > { %750 = vpow2.f32 %v339_v39 }
 0x201   : > { %v751_v40 = vpop.eup %750 }
 0x202   : > { %v347_v41 = vsel %vm322_vm2, %v751_v40, 0.0 }
 0x20f   : > { %348 = vadd.xlane.f32.xlu0 %v347_v41  ;;  %v589_v41 = vld [vmem:[%s111_s22] sm:$0x7] }
 0x263   : > { %v328_v42 = vpop.xlane.xlu0 %327 }
 0x264   : > { %v336_v43 = vsub.f32 %v216_v22, %v328_v42 }
 0x266   : > { %v341_v44 = vmul.f32 1.442695, %v336_v43 }
 0x267   : > { %v331_v45 = vpop.xlane.xlu0 %330 }
 0x268   : > { %752 = vpow2.f32 %v341_v44  ;;  %v337_v46 = vsub.f32 %v266_v27, %v331_v45 }
 0x26a   : > { %v343_v49 = vmul.f32 1.442695, %v337_v46 }
 0x26b   : > { %v334_v50 = vpop.xlane.xlu1 %333  ;;  %v372_v52 = vpop.permute.xlu0 %371 }
 0x26c   : > { %754 = vpow2.f32 %v343_v49  ;;  %v338_v53 = vsub.f32 %v316_v32, %v334_v50  ;;  %v382_v54 = vand.u32 %v380_v51, %v372_v52 }
 0x26e   : > { %v345_v55 = vmul.f32 1.442695, %v338_v53  ;;  %707 = vmatpush3.bf16.msra.mxu0 %v382_v54 }
 0x26f   : > { %v425_v56 = vpop.permute.xlu1 %424  ;;  %718 = vmatprep.subr.bf16.mxu0 %v774_v0 }
 0x270   : > { %756 = vpow2.f32 %v345_v55  ;;  %v430_v57 = vand.u32 %v425_v56, %v380_v51 }
 0x272   : > { %v753_v58 = vpop.eup %752  ;;  %713 = vmatpush3.bf16.msra.mxu1 %v430_v57 }
 0x273   : > { %v350_v59 = vsel %vm322_vm2, %v753_v58, 0.0  ;;  %724 = vmatprep.subr.bf16.mxu1 %v774_v0 }
 0x274   : > { %351 = vadd.xlane.f32.xlu1 %v350_v59 }
 0x276   : > { %v755_v60 = vpop.eup %754 }
 0x277   : > { %v353_v61 = vsel %vm322_vm2, %v755_v60, 0.0 }
 0x278   : > { %354 = vadd.xlane.f32.xlu0 %v353_v61 }
 0x27a   : > { %v757_v62 = vpop.eup %756 }
 0x27b   : > { %v356_v63 = vsel %vm322_vm2, %v757_v62, 0.0 }
 0x27c   : > { %357 = vadd.xlane.f32.xlu1 %v356_v63 }
 0x28d   : > { %472 = vrot.lane.b32.xlu1 %v822_v9, %s780_s16 }
 0x28e   : > { %520 = vrot.lane.b32.xlu0 %v820_v6, %s780_s16 }
 0x29c   : > { %v349_v1 = vpop.xlane.xlu0 %348 }
 0x29d   : > { %758 = vrcp.f32 %v349_v1 }
 0x2a7   : > { %v759_v2 = vpop.eup %758 }
 0x2a8   : > { %v363_v3 = vmul.f32 %v759_v2, %v751_v40 }
 0x2aa   : > { %v367_v4 = vpack.c.bf16 %v363_v3, %v363_v3 }
 0x2ac   : > { %709 = vmatmul.mubr.msk.bf16.vlgmr.msra.gmra.mrb[8].mxu0 %vm373_vm5, %v367_v4 }
 0x2ad   : > { %720 = vmatprep.mubr.msk.bf16.mxu0 %vm775_vm0, %v774_v0 }
 0x301   : > { %v352_v5 = vpop.xlane.xlu1 %351 }
 0x302   : > { %760 = vrcp.f32 %v352_v5 }
 0x305   : > { %v355_v7 = vpop.xlane.xlu0 %354 }
 0x306   : > { %762 = vrcp.f32 %v355_v7 }
 0x309   : > { %v358_v8 = vpop.xlane.xlu1 %357  ;;  %v521_v6 = vpop.permute.xlu0 %520 }
 0x30a   : > { %764 = vrcp.f32 %v358_v8  ;;  %v526_v15 = vand.u32 %v521_v6, %v380_v51 }
 0x30c   : > { %v761_v9 = vpop.eup %760 }
 0x30d   : > { %v364_v10 = vmul.f32 %v761_v9, %v753_v58  ;;  %v473_v11 = vpop.permute.xlu1 %472 }
 0x30e   : > { %v478_v12 = vand.u32 %v473_v11, %v380_v51 }
 0x30f   : > { %v368_v13 = vpack.c.bf16 %v364_v10, %v364_v10 }
 0x310   : > { %v763_v14 = vpop.eup %762  ;;  %719 = vmatpush3.bf16.msra.mxu0 %v478_v12 }
 0x311   : > { %v365_v16 = vmul.f32 %v763_v14, %v755_v60  ;;  %715 = vmatmul.mubr.msk.bf16.vlgmr.msra.gmra.mrb[8].mxu1 %vm373_vm5, %v368_v13 }
 0x312   : > { %725 = vmatpush3.bf16.msra.mxu1 %v526_v15  ;;  %726 = vmatprep.mubr.msk.bf16.mxu1 %vm775_vm0, %v774_v0 }
 0x313   : > { %v369_v17 = vpack.c.bf16 %v365_v16, %v365_v16 }
 0x314   : > { %v765_v18 = vpop.eup %764 }
 0x315   : > { %v366_v19 = vmul.f32 %v765_v18, %v757_v62  ;;  %721 = vmatmul.mubr.msk.bf16.vlgmr.msra.gmra.mrb[12].mxu0 %vm373_vm5, %v369_v17 }
 0x317   : > { %v370_v20 = vpack.c.bf16 %v366_v19, %v366_v19 }
 0x319   : > { %727 = vmatmul.mubr.msk.bf16.vlgmr.msra.gmra.mrb[12].mxu1 %vm373_vm5, %v370_v20 }
 0x37f   : > { %v418_v21 = vpop.f32.mrb[8].mxu0 }
 0x380   : > { %v710_v22 = vpop.f32.mrb[9].mxu0 }
 0x381   : > { %v421_v23 = vpop.f32.mrb[10].mxu0 }
 0x382   : > { %v711_v24 = vpop.f32.mrb[11].mxu0 }
 0x3e4   : > { %v466_v25 = vpop.f32.mrb[8].mxu1 }
 0x3e5   : > { %569 = vrot.lane.b32.xlu1 %v466_v25, %s782_s17  ;;  %v716_v26 = vpop.f32.mrb[9].mxu1 }
 0x3e6   : > { %v469_v27 = vpop.f32.mrb[10].mxu1 }
 0x3e7   : > { %v717_v28 = vpop.f32.mrb[11].mxu1 }
 0x3e8   : > { %v514_v0 = vpop.f32.mrb[12].mxu0 }
 0x3e9   : > { %573 = vrot.lane.b32.xlu0 %v514_v0, %s783_s18  ;;  %v722_v29 = vpop.f32.mrb[13].mxu0 }
 0x3ea   : > { %v517_v30 = vpop.f32.mrb[14].mxu0 }
 0x3eb   : > { %v723_v31 = vpop.f32.mrb[15].mxu0 }
 0x3ec   : > { %v562_v32 = vpop.f32.mrb[12].mxu1 }
 0x3ed   : > { %577 = vrot.lane.b32.xlu1 %v562_v32, %s784_s19  ;;  %v728_v33 = vpop.f32.mrb[13].mxu1 }
 0x3ee   : > { %v565_v34 = vpop.f32.mrb[14].mxu1 }
 0x3ef   : > { %v729_v35 = vpop.f32.mrb[15].mxu1 }
 0x457   : > { %v570_v36 = vpop.permute.xlu1 %569 }
 0x458   : > { %v580_v38 = vsel %vm125_vm1, %v418_v21, %v570_v36 }
 0x45b   : > { %v574_v37 = vpop.permute.xlu0 %573 }
 0x45c   : > { %v582_v39 = vsel %vm581_vm6, %v580_v38, %v574_v37 }
 0x45f   : > { %v578_v40 = vpop.permute.xlu1 %577 }
 0x460   : > { %v584_v42 = vsel %vm583_vm7, %v582_v39, %v578_v40 }
 0x461   : > { %v585_v43 = vpack.c.bf16 %v584_v42, %v584_v42 }
 0x463   : > { %v590_v44 = vsel %vm588_vm10, %v585_v43, %v589_v41 }
 0x464   : > { %591 = vst [vmem:[%s111_s22] sm:$0x7] %v590_v44 }
 0x465 PF: > { %s11_s6 = sadd.s32 1, %s772_s6  }
 0x466   : > { %p8_p4 = scmp.ge.s32.totalorder %s11_s6, 4  }
 0x468   :  { %10 = sbr.rel (!%p8_p4) target bundleno = 1 (0x1), region = 54 }

// kernel: encode_image.17
= control target key start
LH: loop header
LB: loop body
LE: loop exit
PB: predicated region body
PF: predicated region fallthrough
CT: control target
= control target key end

     0   :  { %v140_v0 = vmov 0.0   ;;  %vm141_vm0 = vmmov 0   ;;  %vm48_vm1 = vcmask 261120   ;;  %vm107_vm2 = vcmask 257024   ;;  %s191_s1 = inlined_call_operand.vmem [shape: bf16[32,32], index: 1, kind: input, shape index: {}]   ;;  %s192_s0 = inlined_call_operand.vmem [shape: bf16[10,32], index: 0, kind: input, shape index: {}]   ;;  %s193_s3 = inlined_call_operand.vmem [shape: bf16[10,32], index: 3, kind: input, shape index: {}]   ;;  %s194_s2 = inlined_call_operand.vmem [shape: f32[1,32], index: 2, kind: input, shape index: {}]   ;;  %s195_s4 = inlined_call_operand.vmem [shape: bf16[10,32], index: 4, kind: output, shape index: {}]  }
   0x1   :  { %127 = vmatprep.subr.bf16.mxu0 %v140_v0  ;;  %v137_v1 = vld [vmem:[%s191_s1] sm:$0xff]   ;;  %131 = vmatprep.mubr.msk.bf16.mxu0 %vm141_vm0, %v140_v0  ;;  %v138_v2 = vld [vmem:[%s191_s1 + $0x8] sm:$0xff]   ;;  %vm109_vm3 = vcmask 253952  }
   0x2   :  { %128 = vmatpush3.bf16.msra.mxu0 %v137_v1  ;;  %v139_v3 = vld [vmem:[%s192_s0] sm:$0x1f]  }
   0x3   :  { %129 = vmatprep.subr.bf16.mxu0 %v140_v0  ;;  %v93_v4 = vld [vmem:[%s193_s3] sm:$0xf]  ;;  %v94_v6 = vld [vmem:[%s193_s3 + $0x4] sm:$0x1] }
   0x4   :  { %v115_v5 = vld [vmem:[%s194_s2] ss:$0 sm:$0xff]  ;;  %v95_v7 = vunpack.c.l.bf16 %v93_v4  ;;  %v96_v11 = vunpack.c.l.bf16 %v94_v6 }
   0x6   :  { %130 = vmatpush3.bf16.msra.mxu0 %v138_v2 }
   0x9   :  { %132 = vmatmul.mubr.msk.bf16.vlgmr.msra.gmra.mrb[0].mxu0 %vm48_vm1, %v139_v3 }
  0xdc   :  { %v86_v8 = vpop.f32.mrb[0].mxu0 }
  0xdd   :  { %v87_v9 = vadd.f32 %v115_v5, %v86_v8  ;;  %v133_v10 = vpop.f32.mrb[1].mxu0 }
  0xde   :  { %v89_v12 = vpop.f32.mrb[2].mxu0 }
  0xdf   :  { %v97_v13 = vadd.f32 %v95_v7, %v87_v9  ;;  %v90_v14 = vadd.f32 %v115_v5, %v89_v12  ;;  %v134_v15 = vpop.f32.mrb[3].mxu0 }
  0xe1   :  { %v122_v16 = vpack.c.bf16 %v97_v13, %v97_v13  ;;  %v98_v17 = vadd.f32 %v96_v11, %v90_v14 }
  0xe3   :  { %108 = vst.msk [vmem:[%s195_s4] sm:$0xf] %vm107_vm2, %v122_v16  ;;  %v123_v18 = vpack.c.bf16 %v98_v17, %v98_v17 }
  0xe5   :  { %110 = vst.msk [vmem:[%s195_s4 + $0x4] sm:$0x1] %vm109_vm3, %v123_v18 }

// kernel: encode_image.18
= control target key start
LH: loop header
LB: loop body
LE: loop exit
PB: predicated region body
PF: predicated region fallthrough
CT: control target
= control target key end

     0   :  { %vm29_vm0 = vcmask 261120   ;;  %vm33_vm1 = vcmask 254976   ;;  %v238_v17 = vmov 0.0   ;;  %vm239_vm2 = vmmov 0   ;;  %s300_s0 = inlined_call_operand.vmem [shape: bf16[10,32], index: 0, kind: input, shape index: {}]   ;;  %s301_s3 = inlined_call_operand.vmem [shape: bf16[32,128], index: 3, kind: input, shape index: {}]   ;;  %s302_s1 = inlined_call_operand.vmem [shape: f32[1,32], index: 1, kind: input, shape index: {}]   ;;  %s303_s2 = inlined_call_operand.vmem [shape: f32[1,32], index: 2, kind: input, shape index: {}]   ;;  %s304_s4 = inlined_call_operand.vmem [shape: f32[1,128], index: 4, kind: input, shape index: {}]   ;;  %s305_s5 = inlined_call_operand.vmem [shape: bf16[10,128], index: 5, kind: output, shape index: {}]  }
   0x1   :  { %v25_v0 = vld [vmem:[%s300_s0] sm:$0xf]  ;;  %v26_v1 = vld [vmem:[%s300_s0 + $0x4] sm:$0x1]  ;;  %213 = vmatprep.subr.bf16.mxu0 %v238_v17  ;;  %v224_v18 = vld [vmem:[%s301_s3 + $0x8] sm:$0xff]   ;;  %217 = vmatprep.mubr.msk.bf16.mxu0 %vm239_vm2, %v238_v17  ;;  %vm84_vm3 = vcmask 257024  }
   0x2   :  { %v27_v2 = vunpack.c.l.bf16 %v25_v0  ;;  %v28_v3 = vunpack.c.l.bf16 %v26_v1  ;;  %v223_v16 = vld [vmem:[%s301_s3] sm:$0xff]   ;;  %vm86_vm4 = vcmask 253952  }
   0x3   :  { %214 = vmatpush3.bf16.msra.mxu0 %v223_v16  ;;  %v193_v26 = vld [vmem:[%s302_s1] ss:$0 sm:$0xff] }
   0x4   :  { %v30_v4 = vsel %vm29_vm0, %v27_v2, 0.0  ;;  %v34_v5 = vsel %vm33_vm1, %v28_v3, 0.0  ;;  %215 = vmatprep.subr.bf16.mxu0 %v238_v17  ;;  %v194_v28 = vld [vmem:[%s303_s2] ss:$0 sm:$0xff] }
   0x5   :  { %31 = vadd.xlane.f32.xlu0 %v30_v4  ;;  %v197_v38 = vld [vmem:[%s304_s4] ss:$0 sm:$0xff] }
   0x7   :  { %216 = vmatpush3.bf16.msra.mxu0 %v224_v18 }
   0x9   :  { %35 = vadd.xlane.f32.xlu0 %v34_v5 }
  0x92   :  { %v32_v6 = vpop.xlane.xlu0 %31 }
  0x93   :  { %v38_v7 = vmul.f32 0.03125, %v32_v6 }
  0x95   :  { %v40_v8 = vsub.f32 %v27_v2, %v38_v7 }
  0x96   :  { %v36_v9 = vpop.xlane.xlu0 %35 }
  0x97   :  { %v39_v10 = vmul.f32 0.03125, %v36_v9  ;;  %v42_v11 = vmul.f32 %v40_v8, %v40_v8 }
  0x99   :  { %v41_v12 = vsub.f32 %v28_v3, %v39_v10  ;;  %v44_v13 = vsel %vm29_vm0, %v42_v11, 0.0 }
  0x9a   :  { %45 = vadd.xlane.f32.xlu1 %v44_v13 }
  0x9b   :  { %v43_v14 = vmul.f32 %v41_v12, %v41_v12 }
  0x9d   :  { %v47_v15 = vsel %vm33_vm1, %v43_v14, 0.0 }
  0x9e   :  { %48 = vadd.xlane.f32.xlu1 %v47_v15 }
 0x127   :  { %v46_v19 = vpop.xlane.xlu1 %45 }
 0x128   :  { %v50_v20 = vmul.f32 0.03125, %v46_v19 }
 0x12a   :  { %v52_v21 = vadd.f32 1e-05, %v50_v20 }
 0x12b   :  { %v49_v22 = vpop.xlane.xlu1 %48 }
 0x12c   :  { %226 = vrsqrt.f32 %v52_v21  ;;  %v51_v23 = vmul.f32 0.03125, %v49_v22 }
 0x12e   :  { %v53_v24 = vadd.f32 1e-05, %v51_v23 }
 0x130   :  { %228 = vrsqrt.f32 %v53_v24 }
 0x136   :  { %v227_v25 = vpop.eup %226 }
 0x137   :  { %v56_v27 = vmul.f32 %v227_v25, %v40_v8 }
 0x139   :  { %v65_v29 = vmul.f32 %v193_v26, %v56_v27 }
 0x13a   :  { %v229_v30 = vpop.eup %228 }
 0x13b   :  { %v74_v31 = vadd.f32 %v194_v28, %v65_v29  ;;  %v57_v32 = vmul.f32 %v229_v30, %v41_v12 }
 0x13d   :  { %v206_v33 = vpack.c.bf16 %v74_v31, %v74_v31  ;;  %v66_v34 = vmul.f32 %v193_v26, %v57_v32 }
 0x13f   :  { %85 = vst.msk [vmem:[#allocation2] sm:$0xf] %vm84_vm3, %v206_v33  ;;  %v75_v35 = vadd.f32 %v194_v28, %v66_v34 }
 0x141   :  { %v207_v36 = vpack.c.bf16 %v75_v35, %v75_v35 }
 0x143   :  { %87 = vst.msk [vmem:[#allocation2 + $0x4] sm:$0x1] %vm86_vm4, %v207_v36 }
 0x14a   :  { %v225_v37 = vld [vmem:[#allocation2] sm:$0x1f]  }
 0x14b   :  { %218 = vmatmul.mubr.msk.bf16.vlgmr.msra.gmra.mrb[0].mxu0 %vm29_vm0, %v225_v37 }
 0x21e   :  { %v156_v39 = vpop.f32.mrb[0].mxu0 }
 0x21f   :  { %v157_v40 = vadd.f32 %v197_v38, %v156_v39  ;;  %v219_v41 = vpop.f32.mrb[1].mxu0 }
 0x220   :  { %v159_v42 = vpop.f32.mrb[2].mxu0 }
 0x221   :  { %v202_v43 = vmul.f32 -1.702, %v157_v40  ;;  %v160_v44 = vadd.f32 %v197_v38, %v159_v42  ;;  %v220_v45 = vpop.f32.mrb[3].mxu0 }
 0x223   :  { %v167_v46 = vmul.f32 1.442695, %v202_v43  ;;  %v203_v47 = vmul.f32 -1.702, %v160_v44 }
 0x225   :  { %230 = vpow2.f32 %v167_v46  ;;  %v169_v48 = vmul.f32 1.442695, %v203_v47 }
 0x227   :  { %232 = vpow2.f32 %v169_v48 }
 0x22f   :  { %v231_v49 = vpop.eup %230 }
 0x230   :  { %v171_v50 = vadd.f32 1.0, %v231_v49 }
 0x231   :  { %v233_v51 = vpop.eup %232 }
 0x232   :  { %234 = vrcp.f32 %v171_v50  ;;  %v172_v52 = vadd.f32 1.0, %v233_v51 }
 0x234   :  { %236 = vrcp.f32 %v172_v52 }
 0x23c   :  { %v235_v53 = vpop.eup %234 }
 0x23d   :  { %v177_v54 = vmul.f32 %v235_v53, %v157_v40 }
 0x23e   :  { %v237_v55 = vpop.eup %236 }
 0x23f   :  { %v208_v56 = vpack.c.bf16 %v177_v54, %v177_v54  ;;  %v178_v57 = vmul.f32 %v237_v55, %v160_v44 }
 0x241   :  { %187 = vst [vmem:[%s305_s5] sm:$0xf] %v208_v56  ;;  %v209_v58 = vpack.c.bf16 %v178_v57, %v178_v57 }
 0x243   :  { %188 = vst [vmem:[%s305_s5 + $0x4] sm:$0x1] %v209_v58 }

// kernel: encode_image.19
= control target key start
LH: loop header
LB: loop body
LE: loop exit
PB: predicated region body
PF: predicated region fallthrough
CT: control target
= control target key end

     0   :  { %v214_v0 = vmov 0.0   ;;  %vm215_vm0 = vmmov 0   ;;  %vm152_vm1 = vcmask 257024   ;;  %vm154_vm2 = vcmask 253952   ;;  %s283_s1 = inlined_call_operand.vmem [shape: bf16[128,32], index: 1, kind: input, shape index: {}]   ;;  %s284_s0 = inlined_call_operand.vmem [shape: bf16[10,128], index: 0, kind: input, shape index: {}]   ;;  %s285_s3 = inlined_call_operand.vmem [shape: bf16[10,32], index: 3, kind: input, shape index: {}]   ;;  %s286_s2 = inlined_call_operand.vmem [shape: f32[1,32], index: 2, kind: input, shape index: {}]   ;;  %s287_s4 = inlined_call_operand.vmem [shape: bf16[10,32], index: 4, kind: output, shape index: {}]  }
   0x1   :  { %183 = vmatprep.subr.bf16.mxu0 %v214_v0  ;;  %v205_v1 = vld [vmem:[%s283_s1] sm:$0xff]   ;;  %199 = vmatprep.mubr.msk.bf16.mxu0 %vm215_vm0, %v214_v0  ;;  %v206_v2 = vld [vmem:[%s283_s1 + $0x8] sm:$0xff]   ;;  %v207_v3 = vld [vmem:[%s283_s1 + $0x10] sm:$0xff]  }
   0x2   :  { %184 = vmatpush3.bf16.msra.mxu0 %v205_v1  ;;  %v208_v4 = vld [vmem:[%s283_s1 + $0x18] sm:$0xff]   ;;  %v209_v5 = vld [vmem:[%s283_s1 + $0x20] sm:$0xff]   ;;  %v210_v6 = vld [vmem:[%s283_s1 + $0x28] sm:$0xff]  }
   0x3   :  { %185 = vmatprep.subr.bf16.mxu0 %v214_v0  ;;  %v211_v7 = vld [vmem:[%s283_s1 + $0x30] sm:$0xff]   ;;  %v212_v8 = vld [vmem:[%s283_s1 + $0x38] sm:$0xff]   ;;  %v213_v9 = vld [vmem:[%s284_s0] sm:$0x1f]  }
   0x4   :  { %v138_v10 = vld [vmem:[%s285_s3] sm:$0xf]  ;;  %v139_v12 = vld [vmem:[%s285_s3 + $0x4] sm:$0x1] }
   0x5   :  { %v160_v11 = vld [vmem:[%s286_s2] ss:$0 sm:$0xff]  ;;  %v140_v13 = vunpack.c.l.bf16 %v138_v10  ;;  %v141_v17 = vunpack.c.l.bf16 %v139_v12 }
   0x6   :  { %186 = vmatpush3.bf16.msra.mxu0 %v206_v2 }
   0x7   :  { %187 = vmatprep.subr.bf16.mxu0 %v214_v0 }
   0xa   :  { %188 = vmatpush3.bf16.msra.mxu0 %v207_v3 }
   0xb   :  { %189 = vmatprep.subr.bf16.mxu0 %v214_v0 }
   0xe   :  { %190 = vmatpush3.bf16.msra.mxu0 %v208_v4 }
   0xf   :  { %191 = vmatprep.subr.bf16.mxu0 %v214_v0 }
  0x12   :  { %192 = vmatpush3.bf16.msra.mxu0 %v209_v5 }
  0x13   :  { %193 = vmatprep.subr.bf16.mxu0 %v214_v0 }
  0x16   :  { %194 = vmatpush3.bf16.msra.mxu0 %v210_v6 }
  0x17   :  { %195 = vmatprep.subr.bf16.mxu0 %v214_v0 }
  0x1a   :  { %196 = vmatpush3.bf16.msra.mxu0 %v211_v7 }
  0x1b   :  { %197 = vmatprep.subr.bf16.mxu0 %v214_v0 }
  0x1e   :  { %198 = vmatpush3.bf16.msra.mxu0 %v212_v8 }
  0x21   :  { %200 = vmatmul.mubr.bf16.vlgmr.msra.gmra.mrb[0].mxu0 %v213_v9 }
  0xf4   :  { %v131_v14 = vpop.f32.mrb[0].mxu0 }
  0xf5   :  { %v132_v15 = vadd.f32 %v160_v11, %v131_v14  ;;  %v201_v16 = vpop.f32.mrb[1].mxu0 }
  0xf6   :  { %v134_v18 = vpop.f32.mrb[2].mxu0 }
  0xf7   :  { %v142_v19 = vadd.f32 %v140_v13, %v132_v15  ;;  %v135_v20 = vadd.f32 %v160_v11, %v134_v18  ;;  %v202_v21 = vpop.f32.mrb[3].mxu0 }
  0xf9   :  { %v172_v22 = vpack.c.bf16 %v142_v19, %v142_v19  ;;  %v143_v23 = vadd.f32 %v141_v17, %v135_v20 }
  0xfb   :  { %153 = vst.msk [vmem:[%s287_s4] sm:$0xf] %vm152_vm1, %v172_v22  ;;  %v173_v24 = vpack.c.bf16 %v143_v23, %v143_v23 }
  0xfd   :  { %155 = vst.msk [vmem:[%s287_s4 + $0x4] sm:$0x1] %vm154_vm2, %v173_v24 }

// kernel: encode_image.25
= control target key start
LH: loop header
LB: loop body
LE: loop exit
PB: predicated region body
PF: predicated region fallthrough
CT: control target
= control target key end

     0   :  { %vm28_vm0 = vcmask 254976   ;;  %s257_s0 = inlined_call_operand.vmem [shape: bf16[2,32], index: 0, kind: input, shape index: {}]   ;;  %s258_s1 = inlined_call_operand.vmem [shape: f32[1,32], index: 1, kind: input, shape index: {}]   ;;  %s259_s2 = inlined_call_operand.vmem [shape: f32[1,32], index: 2, kind: input, shape index: {}]   ;;  %s260_s3 = inlined_call_operand.vmem [shape: bf16[32,16], index: 3, kind: input, shape index: {}]   ;;  %s261_s4 = inlined_call_operand.vmem [shape: f32[1,16], index: 4, kind: input, shape index: {}]   ;;  %s262_s5 = inlined_call_operand.hbm [shape: f32[2,16], index: 5, kind: output, shape index: {}]  }
   0x1   :  { %v26_v0 = vld [vmem:[%s257_s0] sm:$0x1] }
   0x2   :  { %v27_v1 = vunpack.c.l.bf16 %v26_v0 }
   0x3   :  { %10 = vsyncpa [#allocation4], 0  ;;  %v166_v8 = vld [vmem:[%s260_s3] sm:$0xff]   ;;  %v194_v9 = vmov 0.0   ;;  %v167_v10 = vld [vmem:[%s260_s3 + $0x8] sm:$0xff]   ;;  %vm195_vm1 = vmmov 0  }
   0x4   :  { %v29_v2 = vsel %vm28_vm0, %v27_v1, 0.0  ;;  %155 = vmatprep.subr.bf16.mxu0 %v194_v9  ;;  %159 = vmatprep.mubr.msk.bf16.mxu0 %vm195_vm1, %v194_v9  ;;  %v146_v15 = vld [vmem:[%s258_s1] ss:$0 sm:$0xff]  ;;  %vm60_vm2 = vcmask 253952   ;;  %vm86_vm3 = vcmask 261120   ;;  %s196_s28 = smov [#allocation3]  }
   0x5   :  { %30 = vadd.xlane.f32.xlu0 %v29_v2  ;;  %156 = vmatpush3.bf16.msra.mxu0 %v166_v8  ;;  %v147_v17 = vld [vmem:[%s259_s2] ss:$0 sm:$0xff]  ;;  %s138_s29 = sshll.u32 %s196_s28, 4  ;;  %vm130_vm4 = vcmask 123904   ;;  %s139_s29 = int_to_ptr.vmem [resolvable:$true] %s138_s29 }
   0x6   :  { %157 = vmatprep.subr.bf16.mxu0 %v194_v9  ;;  %v148_v22 = vld [vmem:[%s261_s4] ss:$0 sm:$0xff]  ;;  %s170_s1 = scalar_lea.vmem %s139_s29, 32  ;;  %p175_p1 = scmp.lt.s32.totalorder %s139_s29, %s139_s29 }
   0x7   :  { %p171_p0 = scmp.ne.s32.totalorder %s139_s29, %s170_s1  ;;  %p176_p2 = scmp.lt.s32.totalorder %s170_s1, %s170_s1 }
   0x9   :  { %158 = vmatpush3.bf16.msra.mxu0 %v167_v10  ;;  %p177_p3 = por %p176_p2, %p175_p1 }
   0xb   :  { %p178_p4 = pnand %p177_p3, %p171_p0 }
  0x92   :  { %v31_v3 = vpop.xlane.xlu0 %30 }
  0x93   :  { %v33_v4 = vmul.f32 0.03125, %v31_v3 }
  0x95   :  { %v34_v5 = vsub.f32 %v27_v1, %v33_v4 }
  0x97   :  { %v35_v6 = vmul.f32 %v34_v5, %v34_v5 }
  0x99   :  { %v36_v7 = vsel %vm28_vm0, %v35_v6, 0.0 }
  0x9a   :  { %37 = vadd.xlane.f32.xlu0 %v36_v7 }
 0x127   :  { %v38_v11 = vpop.xlane.xlu0 %37 }
 0x128   :  { %v39_v12 = vmul.f32 0.03125, %v38_v11 }
 0x12a   :  { %v40_v13 = vadd.f32 1e-05, %v39_v12 }
 0x12c   :  { %168 = vrsqrt.f32 %v40_v13 }
 0x136   :  { %v169_v14 = vpop.eup %168 }
 0x137   :  { %v42_v16 = vmul.f32 %v169_v14, %v34_v5 }
 0x139   :  { %v50_v18 = vmul.f32 %v146_v15, %v42_v16 }
 0x13b   :  { %v58_v19 = vadd.f32 %v147_v17, %v50_v18 }
 0x13d   :  { %v59_v20 = vpack.c.bf16 %v58_v19, %v58_v19 }
 0x13f   :  { %61 = vst.msk [vmem:[#allocation2] sm:$0x1] %vm60_vm2, %v59_v20 }
 0x146   :  { %v62_v21 = vld [vmem:[#allocation2] sm:$0x1] }
 0x147   :  { %160 = vmatmul.mubr.msk.bf16.vlgmr.msra.gmra.mrb[0].mxu0 %vm86_vm3, %v62_v21 }
 0x21a   :  { %v124_v23 = vpop.f32.mrb[0].mxu0 }
 0x21b   :  { %v125_v24 = vadd.f32 %v148_v22, %v124_v23  ;;  %v161_v25 = vpop.f32.mrb[1].mxu0 }
 0x21c   :  { %v127_v26 = vpop.f32.mrb[2].mxu0 }
 0x21d   :  { %v162_v27 = vpop.f32.mrb[3].mxu0  ;;  %131 = vst.msk [vmem:[#allocation3] sm:$0x3] %vm130_vm4, %v125_v24 }
 0x21e   :  { %181 = shalt.err (!%p178_p4)
}
 0x21f   :  { %s182_s4 = scalar_lea.hbm %s262_s5, 32 }
 0x220   :  { %p183_p5 = scmp.ne.s32.totalorder %s262_s5, %s182_s4  ;;  %p186_p6 = scmp.lt.u32.totalorder %s182_s4, %s262_s5 }
 0x222   :  { %p188_p7 = pnand %p186_p6, %p183_p5 }
 0x224   :  { %191 = shalt.err (!%p188_p7)
}
 0x225   :  { %141 = dma.vmem_to_hbm [thread:$0]  %s139_s29, 32, %s262_s5, [#allocation4]  }
 0x226   :  { %192 = dma.done.wait [#allocation4], 32  }
 0x227   :  { %193 = vsyncadd [#allocation4], 4294967264 }
 0x228   :  { %145 = vsyncpa [#allocation4], 1 }

</bundles_post_ra>
